<compile_context>
chip_gen: v5e
topology: v5e:2x2
jax: 0.10.0
libtpu: 0.0.40
codegen_flags: <defaults>
</compile_context>

<pallas_src>
import jax
import jax.numpy as jnp
from jax.experimental import pallas as pl
from jax.experimental.pallas import tpu as pltpu

N_CLASSES = 10
IMG_FEATURES = 28 * 28          # 784
H1 = 512
H2 = 256


def _leaky_relu(x, slope=0.2):
    return jnp.where(x > 0, x, slope * x)


def discriminator_kernel(x_ref, lbl_ref, w1i_ref, w1l_ref, b1_ref,
                         w2_ref, b2_ref, w3_ref, b3_ref, out_ref):
    # ---- layer 1: x @ W1_img + one_hot(y) @ W1_lbl + b1 --------------------
    # x arrives in its native dtype (bf16 / uint8 / f32); cast is VPU filler
    # hidden under the input DMA.
    x = x_ref[...].astype(jnp.bfloat16)                        # (TB, 784)
    h = jnp.dot(x, w1i_ref[...], preferred_element_type=jnp.float32)

    lbl = lbl_ref[...]                                         # (TB, 1) int32
    classes = jax.lax.broadcasted_iota(jnp.int32, (lbl.shape[0], N_CLASSES), 1)
    one_hot = (lbl == classes).astype(jnp.bfloat16)            # (TB, 10)
    h = h + jnp.dot(one_hot, w1l_ref[...], preferred_element_type=jnp.float32)
    h = _leaky_relu(h + b1_ref[...])                           # (TB, 512) f32

    # ---- layer 2 ------------------------------------------------------------
    h = jnp.dot(h.astype(jnp.bfloat16), w2_ref[...],
                preferred_element_type=jnp.float32)
    h = _leaky_relu(h + b2_ref[...])                           # (TB, 256) f32

    # ---- layer 3 (N=1): lane reduction + sigmoid epilogue (off the MXU) -----
    logit = jnp.sum(h * w3_ref[...], axis=-1, keepdims=True) + b3_ref[0, 0]
    out_ref[...] = jax.nn.sigmoid(logit)                       # (TB, 1) f32


def _hw_defaults():
    """(tb_max, vmem_limit_bytes). 1024 everywhere; 2048 on v7x where faster
    HBM makes per-step overhead the larger fraction. 48 MB limit is safe on
    all generations (v7x physical VMEM is 64 MiB/TC, v5e/v6e have 128 MiB)."""
    tb_max = 1024
    vmem_limit = 48 * 1024 * 1024
    try:
        kind = jax.devices()[0].device_kind.lower()
        if "v7" in kind or "7x" in kind:
            tb_max = 2048
    except Exception:
        pass
    return tb_max, vmem_limit


def _tile_plan(b, tb_max):
    """Pick (tb, n_tiles) minimizing remainder padding; tb multiple of 8.
    Keep the grid length even (>=2) for non-tiny batches so the "parallel"
    batch axis can be sharded across both TensorCores on v7x."""
    n_tiles = max(1, -(-b // tb_max))       # ceil(b / tb_max)
    if b >= 16:
        n_tiles = max(2, n_tiles + (n_tiles % 2))
    tb = -(-b // n_tiles)                   # ceil(b / n_tiles)
    tb = max(8, ((tb + 7) // 8) * 8)        # sublane-aligned
    return tb, n_tiles


def init_params(key):
    """torch.nn.Linear-style init (uniform +/- 1/sqrt(fan_in)); weights (in,out),
    W1 split into image/label halves and big weights cast to bf16."""
    keys = jax.random.split(key, 6)
    in_features = IMG_FEATURES + N_CLASSES

    def linear(kw, kb, fan_in, fan_out):
        bound = 1.0 / jnp.sqrt(jnp.float32(fan_in))
        w = jax.random.uniform(kw, (fan_in, fan_out), jnp.float32, -bound, bound)
        b = jax.random.uniform(kb, (1, fan_out), jnp.float32, -bound, bound)
        return w, b

    w1, b1 = linear(keys[0], keys[1], in_features, H1)
    w2, b2 = linear(keys[2], keys[3], H1, H2)
    w3, b3 = linear(keys[4], keys[5], H2, 1)

    return dict(
        w1_img=w1[:IMG_FEATURES].astype(jnp.bfloat16),   # (784, 512) bf16
        w1_lbl=w1[IMG_FEATURES:].astype(jnp.bfloat16),   # (10, 512)  bf16
        b1=b1,                                           # (1, 512)   f32
        w2=w2.astype(jnp.bfloat16),                      # (512, 256) bf16
        b2=b2,                                           # (1, 256)   f32
        w3_row=w3.T,                                     # (1, 256)   f32
        b3=b3.reshape(1, 1),                             # (1, 1)     f32 (SMEM)
    )


@jax.jit
def discriminator_forward(x, y, params):
    b = x.shape[0]
    # Keep x in its native dtype (bf16 / uint8 / f32) -- cast happens in-kernel.
    x_flat = x.reshape(b, IMG_FEATURES)                      # x.view(B, -1)
    labels = y.reshape(b, 1).astype(jnp.int32)

    tb_max, vmem_limit = _hw_defaults()
    tb, n_tiles = _tile_plan(b, tb_max)
    b_pad = tb * n_tiles
    if b_pad != b:
        x_flat = jnp.pad(x_flat, ((0, b_pad - b), (0, 0)))
        labels = jnp.pad(labels, ((0, b_pad - b), (0, 0)))

    grid_spec = pltpu.PrefetchScalarGridSpec(
        num_scalar_prefetch=0,
        grid=(n_tiles,),
        in_specs=[
            pl.BlockSpec((tb, IMG_FEATURES), lambda i: (i, 0)),     # x tile
            pl.BlockSpec((tb, 1), lambda i: (i, 0)),                # label tile
            pl.BlockSpec((IMG_FEATURES, H1), lambda i: (0, 0)),     # W1_img (resident)
            pl.BlockSpec((N_CLASSES, H1), lambda i: (0, 0)),        # W1_lbl (resident)
            pl.BlockSpec((1, H1), lambda i: (0, 0)),                # b1
            pl.BlockSpec((H1, H2), lambda i: (0, 0)),               # W2 (resident)
            pl.BlockSpec((1, H2), lambda i: (0, 0)),                # b2
            pl.BlockSpec((1, H2), lambda i: (0, 0)),                # w3 row
            pl.BlockSpec(memory_space=pltpu.MemorySpace.SMEM),      # b3 scalar
        ],
        out_specs=pl.BlockSpec((tb, 1), lambda i: (i, 0)),
    )

    out = pl.pallas_call(
        discriminator_kernel,
        out_shape=jax.ShapeDtypeStruct((b_pad, 1), jnp.float32),
        grid_spec=grid_spec,
        compiler_params=pltpu.CompilerParams(
            dimension_semantics=("parallel",),
            vmem_limit_bytes=vmem_limit,
        ),
    )(x_flat, labels, params["w1_img"], params["w1_lbl"], params["b1"],
      params["w2"], params["b2"], params["w3_row"], params["b3"])

    return out[:b]


def reference_forward(x, y, params):
    """Pure-JAX reference using the same bf16-quantized weights / f32 accumulation."""
    b = x.shape[0]
    x_flat = x.reshape(b, IMG_FEATURES).astype(jnp.bfloat16)
    one_hot = jax.nn.one_hot(y, N_CLASSES, dtype=jnp.bfloat16)
    h = (jnp.dot(x_flat, params["w1_img"], preferred_element_type=jnp.float32)
         + jnp.dot(one_hot, params["w1_lbl"], preferred_element_type=jnp.float32)
         + params["b1"])
    h = _leaky_relu(h)
    h = jnp.dot(h.astype(jnp.bfloat16), params["w2"],
                preferred_element_type=jnp.float32) + params["b2"]
    h = _leaky_relu(h)
    logit = jnp.sum(h * params["w3_row"], axis=-1, keepdims=True) + params["b3"][0, 0]
    return jax.nn.sigmoid(logit)


if __name__ == "__main__":
    key = jax.random.PRNGKey(0)
    k_params, k_x, k_y, k_x2, k_y2 = jax.random.split(key, 5)

    params = init_params(k_params)

    # Small MNIST-like batch (NCHW).  bf16 input exercises the narrow-dtype
    # path (as if produced by the cGAN generator).
    batch = 2
    x = jax.random.normal(k_x, (batch, 1, 28, 28), dtype=jnp.bfloat16)
    y = jax.random.randint(k_y, (batch,), 0, N_CLASSES, dtype=jnp.int32)

    out = jax.block_until_ready(discriminator_forward(x, y, params))
    ref = reference_forward(x, y, params)
    assert out.shape == (batch, 1)
    assert jnp.allclose(out, ref, atol=2e-3, rtol=2e-3)

    # Second check: f32 input, multi-tile grid with remainder-aware tiling
    # (b=600 -> 2 tiles of 304, padded to 608).
    batch2 = 600
    x2 = jax.random.normal(k_x2, (batch2, 1, 28, 28), dtype=jnp.float32)
    y2 = jax.random.randint(k_y2, (batch2,), 0, N_CLASSES, dtype=jnp.int32)
    out2 = jax.block_until_ready(discriminator_forward(x2, y2, params))
    ref2 = reference_forward(x2, y2, params)
    assert out2.shape == (batch2, 1)
    assert jnp.allclose(out2, ref2, atol=2e-3, rtol=2e-3)

    print("KERNEL_OK")
</pallas_src>

<mosaic_0001>
module attributes {stable_mosaic.version = 11 : i64} {
  func.func @discriminator_kernel(%arg0: i32, %arg1: memref<8x784xbf16, #tpu.memory_space<vmem>>, %arg2: memref<8x1xi32, #tpu.memory_space<vmem>>, %arg3: memref<784x512xbf16, #tpu.memory_space<vmem>>, %arg4: memref<10x512xbf16, #tpu.memory_space<vmem>>, %arg5: memref<1x512xf32, #tpu.memory_space<vmem>>, %arg6: memref<512x256xbf16, #tpu.memory_space<vmem>>, %arg7: memref<1x256xf32, #tpu.memory_space<vmem>>, %arg8: memref<1x256xf32, #tpu.memory_space<vmem>>, %arg9: memref<1x1xf32, #tpu.memory_space<smem>>, %arg10: memref<8x1xf32, #tpu.memory_space<vmem>>) attributes {dimension_semantics = [#tpu.dimension_semantics<parallel>], iteration_bounds = array<i64: 1>, scalar_prefetch = 0 : i64, scratch_operands = 0 : i64, tpu.core_type = #tpu.core_type<tc>, window_params = [{transform_indices = @transform_0, window_bounds = array<i64: 8, 784>}, {transform_indices = @transform_1, window_bounds = array<i64: 8, 1>}, {pipeline_mode = #tpu.pipeline_mode<synchronous>, transform_indices = @transform_2, window_bounds = array<i64: 784, 512>}, {pipeline_mode = #tpu.pipeline_mode<synchronous>, transform_indices = @transform_3, window_bounds = array<i64: 10, 512>}, {pipeline_mode = #tpu.pipeline_mode<synchronous>, transform_indices = @transform_4, window_bounds = array<i64: 1, 512>}, {pipeline_mode = #tpu.pipeline_mode<synchronous>, transform_indices = @transform_5, window_bounds = array<i64: 512, 256>}, {pipeline_mode = #tpu.pipeline_mode<synchronous>, transform_indices = @transform_6, window_bounds = array<i64: 1, 256>}, {pipeline_mode = #tpu.pipeline_mode<synchronous>, transform_indices = @transform_7, window_bounds = array<i64: 1, 256>}, {transform_indices = @transform_8, window_bounds = array<i64: 1, 1>}, {transform_indices = @transform_9, window_bounds = array<i64: 8, 1>}]} {
    %c0 = arith.constant 0 : index
    %c0_0 = arith.constant 0 : index
    %0 = vector.load %arg1[%c0, %c0_0] : memref<8x784xbf16, #tpu.memory_space<vmem>>, vector<8x784xbf16>
    %c0_1 = arith.constant 0 : index
    %c0_2 = arith.constant 0 : index
    %1 = vector.load %arg3[%c0_1, %c0_2] : memref<784x512xbf16, #tpu.memory_space<vmem>>, vector<784x512xbf16>
    %cst = arith.constant dense<0.000000e+00> : vector<8x512xf32>
    %2 = tpu.matmul %0, %1, %cst {dimension_numbers = #tpu.dot_dimension_numbers<[1], [0], [0], [1], [0, 0, 1, 1], [], []>} : vector<8x784xbf16>, vector<784x512xbf16>, vector<8x512xf32> -> vector<8x512xf32>
    %c0_3 = arith.constant 0 : index
    %c0_4 = arith.constant 0 : index
    %3 = vector.load %arg2[%c0_3, %c0_4] : memref<8x1xi32, #tpu.memory_space<vmem>>, vector<8x1xi32>
    %4 = tpu.iota {dimensions = array<i32: 1>} : vector<8x10xi32>
    %5 = vector.broadcast %3 : vector<8x1xi32> to vector<8x10xi32>
    %6 = arith.cmpi eq, %5, %4 : vector<8x10xi32>
    %7 = arith.extui %6 : vector<8x10xi1> to vector<8x10xi32>
    %8 = arith.sitofp %7 : vector<8x10xi32> to vector<8x10xf32>
    %9 = arith.truncf %8 : vector<8x10xf32> to vector<8x10xbf16>
    %c0_5 = arith.constant 0 : index
    %c0_6 = arith.constant 0 : index
    %10 = vector.load %arg4[%c0_5, %c0_6] : memref<10x512xbf16, #tpu.memory_space<vmem>>, vector<10x512xbf16>
    %cst_7 = arith.constant dense<0.000000e+00> : vector<8x512xf32>
    %11 = tpu.matmul %9, %10, %cst_7 {dimension_numbers = #tpu.dot_dimension_numbers<[1], [0], [0], [1], [0, 0, 1, 1], [], []>} : vector<8x10xbf16>, vector<10x512xbf16>, vector<8x512xf32> -> vector<8x512xf32>
    %12 = arith.addf %2, %11 : vector<8x512xf32>
    %c0_8 = arith.constant 0 : index
    %c0_9 = arith.constant 0 : index
    %13 = vector.load %arg5[%c0_8, %c0_9] : memref<1x512xf32, #tpu.memory_space<vmem>>, vector<1x512xf32>
    %14 = vector.broadcast %13 : vector<1x512xf32> to vector<8x512xf32>
    %15 = arith.addf %12, %14 : vector<8x512xf32>
    %cst_10 = arith.constant 0.000000e+00 : f32
    %16 = vector.broadcast %cst_10 : f32 to vector<8x512xf32>
    %17 = arith.cmpf ogt, %15, %16 : vector<8x512xf32>
    %cst_11 = arith.constant 2.000000e-01 : f32
    %18 = vector.broadcast %cst_11 : f32 to vector<8x512xf32>
    %19 = arith.mulf %18, %15 : vector<8x512xf32>
    %20 = arith.select %17, %15, %19 : vector<8x512xi1>, vector<8x512xf32>
    %21 = arith.truncf %20 : vector<8x512xf32> to vector<8x512xbf16>
    %c0_12 = arith.constant 0 : index
    %c0_13 = arith.constant 0 : index
    %22 = vector.load %arg6[%c0_12, %c0_13] : memref<512x256xbf16, #tpu.memory_space<vmem>>, vector<512x256xbf16>
    %cst_14 = arith.constant dense<0.000000e+00> : vector<8x256xf32>
    %23 = tpu.matmul %21, %22, %cst_14 {dimension_numbers = #tpu.dot_dimension_numbers<[1], [0], [0], [1], [0, 0, 1, 1], [], []>} : vector<8x512xbf16>, vector<512x256xbf16>, vector<8x256xf32> -> vector<8x256xf32>
    %c0_15 = arith.constant 0 : index
    %c0_16 = arith.constant 0 : index
    %24 = vector.load %arg7[%c0_15, %c0_16] : memref<1x256xf32, #tpu.memory_space<vmem>>, vector<1x256xf32>
    %25 = vector.broadcast %24 : vector<1x256xf32> to vector<8x256xf32>
    %26 = arith.addf %23, %25 : vector<8x256xf32>
    %cst_17 = arith.constant 0.000000e+00 : f32
    %27 = vector.broadcast %cst_17 : f32 to vector<8x256xf32>
    %28 = arith.cmpf ogt, %26, %27 : vector<8x256xf32>
    %cst_18 = arith.constant 2.000000e-01 : f32
    %29 = vector.broadcast %cst_18 : f32 to vector<8x256xf32>
    %30 = arith.mulf %29, %26 : vector<8x256xf32>
    %31 = arith.select %28, %26, %30 : vector<8x256xi1>, vector<8x256xf32>
    %c0_19 = arith.constant 0 : index
    %c0_20 = arith.constant 0 : index
    %32 = vector.load %arg8[%c0_19, %c0_20] : memref<1x256xf32, #tpu.memory_space<vmem>>, vector<1x256xf32>
    %33 = vector.broadcast %32 : vector<1x256xf32> to vector<8x256xf32>
    %34 = arith.mulf %31, %33 : vector<8x256xf32>
    %cst_21 = arith.constant dense<0.000000e+00> : vector<8xf32>
    %35 = vector.multi_reduction <add>, %34, %cst_21 [1] : vector<8x256xf32> to vector<8xf32>
    %36 = vector.shape_cast %35 : vector<8xf32> to vector<8x1xf32>
    %c0_22 = arith.constant 0 : index
    %c0_23 = arith.constant 0 : index
    %37 = memref.load %arg9[%c0_22, %c0_23] : memref<1x1xf32, #tpu.memory_space<smem>>
    %38 = vector.broadcast %37 : f32 to vector<8x1xf32>
    %39 = arith.addf %36, %38 : vector<8x1xf32>
    %40 = arith.negf %39 : vector<8x1xf32>
    %41 = math.exp %40 : vector<8x1xf32>
    %cst_24 = arith.constant 1.000000e+00 : f32
    %42 = vector.broadcast %cst_24 : f32 to vector<8x1xf32>
    %43 = arith.addf %42, %41 : vector<8x1xf32>
    %44 = arith.divf %42, %43 : vector<8x1xf32>
    %c0_25 = arith.constant 0 : index
    %c0_26 = arith.constant 0 : index
    %45 = vector.load %arg10[%c0_25, %c0_26] : memref<8x1xf32, #tpu.memory_space<vmem>>, vector<8x1xf32>
    tpu.vector_store %arg10[%c0_25, %c0_26], %44 {strides = array<i32>} : memref<8x1xf32, #tpu.memory_space<vmem>>, vector<8x1xf32>,
    return
  }
  func.func @transform_0(%arg0: i32) -> (i32, i32) {
    %c0_i32 = arith.constant 0 : i32
    %c0_i32_0 = arith.constant 0 : i32
    return %arg0, %c0_i32 : i32, i32
  }
  func.func @transform_1(%arg0: i32) -> (i32, i32) {
    %c0_i32 = arith.constant 0 : i32
    %c0_i32_0 = arith.constant 0 : i32
    return %arg0, %c0_i32 : i32, i32
  }
  func.func @transform_2(%arg0: i32) -> (i32, i32) {
    %c0_i32 = arith.constant 0 : i32
    %c0_i32_0 = arith.constant 0 : i32
    %c0_i32_1 = arith.constant 0 : i32
    return %c0_i32, %c0_i32_0 : i32, i32
  }
  func.func @transform_3(%arg0: i32) -> (i32, i32) {
    %c0_i32 = arith.constant 0 : i32
    %c0_i32_0 = arith.constant 0 : i32
    %c0_i32_1 = arith.constant 0 : i32
    return %c0_i32, %c0_i32_0 : i32, i32
  }
  func.func @transform_4(%arg0: i32) -> (i32, i32) {
    %c0_i32 = arith.constant 0 : i32
    %c0_i32_0 = arith.constant 0 : i32
    %c0_i32_1 = arith.constant 0 : i32
    return %c0_i32, %c0_i32_0 : i32, i32
  }
  func.func @transform_5(%arg0: i32) -> (i32, i32) {
    %c0_i32 = arith.constant 0 : i32
    %c0_i32_0 = arith.constant 0 : i32
    %c0_i32_1 = arith.constant 0 : i32
    return %c0_i32, %c0_i32_0 : i32, i32
  }
  func.func @transform_6(%arg0: i32) -> (i32, i32) {
    %c0_i32 = arith.constant 0 : i32
    %c0_i32_0 = arith.constant 0 : i32
    %c0_i32_1 = arith.constant 0 : i32
    return %c0_i32, %c0_i32_0 : i32, i32
  }
  func.func @transform_7(%arg0: i32) -> (i32, i32) {
    %c0_i32 = arith.constant 0 : i32
    %c0_i32_0 = arith.constant 0 : i32
    %c0_i32_1 = arith.constant 0 : i32
    return %c0_i32, %c0_i32_0 : i32, i32
  }
  func.func @transform_8(%arg0: i32) -> (i32, i32) {
    %c0_i32 = arith.constant 0 : i32
    %c0_i32_0 = arith.constant 0 : i32
    %c0_i32_1 = arith.constant 0 : i32
    return %c0_i32, %c0_i32_0 : i32, i32
  }
  func.func @transform_9(%arg0: i32) -> (i32, i32) {
    %c0_i32 = arith.constant 0 : i32
    %c0_i32_0 = arith.constant 0 : i32
    return %arg0, %c0_i32 : i32, i32
  }
}

</mosaic_0001>

<bundles_post_ra>
// kernel: discriminator_forward.1
= control target key start
LH: loop header
LB: loop body
LE: loop exit
PB: predicated region body
PF: predicated region fallthrough
CT: control target
= control target key end

     0   :  { %15 = vsyncpa [#allocation4], 0  ;;  %s3902_s0 = inlined_call_operand.vmem [shape: bf16[8,784], index: 0, kind: input, shape index: {}]   ;;  %s3903_s1 = inlined_call_operand.vmem [shape: s32[8,1], index: 1, kind: input, shape index: {}]   ;;  %s3904_s2 = inlined_call_operand.hbm [shape: bf16[784,512], index: 2, kind: input, shape index: {}]   ;;  %s3905_s3 = inlined_call_operand.vmem [shape: bf16[10,512], index: 3, kind: input, shape index: {}]   ;;  %s3906_s4 = inlined_call_operand.vmem [shape: f32[1,512], index: 4, kind: input, shape index: {}]   ;;  %s3907_s5 = inlined_call_operand.hbm [shape: bf16[512,256], index: 5, kind: input, shape index: {}]   ;;  %s3908_s6 = inlined_call_operand.vmem [shape: f32[1,256], index: 6, kind: input, shape index: {}]   ;;  %s3909_s7 = inlined_call_operand.vmem [shape: f32[1,256], index: 7, kind: input, shape index: {}]   ;;  %s3910_s8 = inlined_call_operand.<no memory space> [shape: f32[1,1], index: 8, kind: input, shape index: {}]   ;;  %s3911_s9 = inlined_call_operand.vmem [shape: f32[8,1], index: 9, kind: output, shape index: {}]  }
   0x1   :  { %s25_s11 = sshll.u32 %s3904_s2, 4  ;;  %s26_s11 = int_to_ptr.hbm [resolvable:$true] %s25_s11 }
   0x2   :  { %16 = vsyncpa [#allocation6], 0  ;;  %s3703_s12 = smov [#allocation3]   ;;  %s42_s16 = sshll.u32 %s3907_s5, 4  ;;  %s43_s16 = int_to_ptr.hbm [resolvable:$true] %s42_s16 }
   0x3   :  { %s27_s13 = sshll.u32 %s3703_s12, 4  ;;  %s3704_s17 = smov 256   ;;  %s28_s13 = int_to_ptr.vmem [resolvable:$true] %s27_s13 }
   0x4   :  { %s3705_s18 = smov 16   ;;  %s3706_s19 = smov [#allocation5]  }
   0x5   :  { %33 = dma.hbm_to_vmem [thread:$0]  %s26_s11, 25088, %s28_s13, [#allocation4], %s3704_s17, %s3704_s17, %s3705_s18  }
   0x6   :  { %s44_s20 = sshll.u32 %s3706_s19, 4  ;;  %s3707_s21 = smov 128   ;;  %s45_s20 = int_to_ptr.vmem [resolvable:$true] %s44_s20 }
   0x7   :  { %s3708_s22 = smov 8  }
   0x8   :  { %50 = dma.hbm_to_vmem [thread:$0]  %s43_s16, 8192, %s45_s20, [#allocation6], %s3707_s21, %s3707_s21, %s3708_s22  }
   0x9   :  { %3699 = dma.done.wait [#allocation4], 25088  }
   0xa   :  { %3700 = vsyncadd [#allocation4], 4294942208 }
   0xb   :  { %3701 = dma.done.wait [#allocation6], 8192  }
   0xc   :  { %3702 = vsyncadd [#allocation6], 4294959104  ;;  %v3709_v0 = vmov 0   ;;  %v266_v1 = vld [vmem:[%s3903_s1] sm:$0xff]  ;;  %v3572_v3 = vld [vmem:[%s3905_s3 + $0xc] sm:$0x10] }
   0xd   :  { %3646 = vset.pattern.permute.xlu0 %v3709_v0  ;;  %v2311_v2 = vld [vmem:[%s3905_s3] sm:$0xf]  ;;  %vm300_vm0 = vcmask 1044480   ;;  %v3570_v5 = vld [vmem:[%s3905_s3 + $0x4] sm:$0xf]  ;;  %vm296_vm2 = vcmask 80896  }
   0xe   :  { %270 = vperm.xlu0 %3646, %v266_v1   ;;  %v2312_v4 = vor.u32 %v3572_v3, %v2311_v2  ;;  %v2313_v6 = vld [vmem:[%s3905_s3 + $0x10] sm:$0x10]  ;;  %v3571_v7 = vld [vmem:[%s3905_s3 + $0xc] sm:$0xf]  ;;  %v2321_v9 = vld [vmem:[%s3905_s3 + $0x18] sm:$0x10] }
   0xf   :  { %v2316_v8 = vor.u32 %v3570_v5, %v2313_v6  ;;  %v2443_v10 = vld [vmem:[#allocation3 + $0xe0] sm:$0xf]  ;;  %v3404_v11 = vld [vmem:[#allocation3 + $0xec] sm:$0xf0]  ;;  %v2324_v13 = vor.u32 %v3571_v7, %v2321_v9  ;;  %v2319_v39 = vld [vmem:[%s3905_s3 + $0x8] sm:$0xf] }
  0x10   :  { %v302_v12 = vsel %vm300_vm0, %v2312_v4, 0  ;;  %v2444_v14 = vor.u32 %v3404_v11, %v2443_v10  ;;  %v2571_v15 = vld [vmem:[#allocation3 + $0x1e0] sm:$0xf]  ;;  %v3436_v16 = vld [vmem:[#allocation3 + $0x1ec] sm:$0xf0]  ;;  %vm1369_vm3 = vcmask 130048  }
  0x11   :  { %320 = vmatpush.bf16.msra.mxu0 %v302_v12  ;;  %v305_v17 = vsel %vm300_vm0, %v2316_v8, 0  ;;  %v2572_v18 = vor.u32 %v3436_v16, %v2571_v15  ;;  %v2827_v19 = vld [vmem:[#allocation3 + $0x3e0] sm:$0xf]  ;;  %v3500_v20 = vld [vmem:[#allocation3 + $0x3ec] sm:$0xf0]  ;;  %v311_v21 = vsel %vm300_vm0, %v2324_v13, 0 }
  0x12   :  { %333 = vmatpush.bf16.msra.mxu1 %v305_v17  ;;  %v2828_v22 = vor.u32 %v3500_v20, %v2827_v19  ;;  %v2427_v23 = vld [vmem:[#allocation3 + $0xc0] sm:$0xf]  ;;  %v3400_v24 = vld [vmem:[#allocation3 + $0xcc] sm:$0xf0]  ;;  %359 = vmatpush.bf16.msra.mxu3 %v311_v21  ;;  %v3573_v40 = vld [vmem:[%s3905_s3 + $0x14] sm:$0x10] }
  0x13   :  { %v2428_v25 = vor.u32 %v3400_v24, %v2427_v23  ;;  %v2555_v26 = vld [vmem:[#allocation3 + $0x1c0] sm:$0xf]  ;;  %v3432_v27 = vld [vmem:[#allocation3 + $0x1cc] sm:$0xf0]  ;;  %v2320_v42 = vor.u32 %v3573_v40, %v2319_v39  ;;  %vm2300_vm12 = vcmask 7168  }
  0x14   :  { %v2811_v28 = vld [vmem:[#allocation3 + $0x3c0] sm:$0xf]  ;;  %v2556_v29 = vor.u32 %v3432_v27, %v2555_v26  ;;  %v3496_v30 = vld [vmem:[#allocation3 + $0x3cc] sm:$0xf0] }
  0x15   :  { %1373 = vmatpush.bf16.msrb.mxu0 %v2444_v14  ;;  %v2411_v31 = vld [vmem:[#allocation3 + $0xa0] sm:$0xf]  ;;  %v3396_v32 = vld [vmem:[#allocation3 + $0xac] sm:$0xf0]  ;;  %v2812_v33 = vor.u32 %v3496_v30, %v2811_v28  ;;  %v308_v50 = vsel %vm300_vm0, %v2320_v42, 0 }
  0x16   :  { %1386 = vmatpush.bf16.msrb.mxu1 %v2572_v18  ;;  %1412 = vmatpush.bf16.msrb.mxu3 %v2828_v22  ;;  %v2539_v34 = vld [vmem:[#allocation3 + $0x1a0] sm:$0xf]  ;;  %v3428_v35 = vld [vmem:[#allocation3 + $0x1ac] sm:$0xf0]  ;;  %v2412_v37 = vor.u32 %v3396_v32, %v2411_v31 }
  0x17   :  { %v2795_v36 = vld [vmem:[#allocation3 + $0x3a0] sm:$0xf]  ;;  %v3492_v38 = vld [vmem:[#allocation3 + $0x3ac] sm:$0xf0]  ;;  %v2540_v41 = vor.u32 %v3428_v35, %v2539_v34  ;;  %346 = vmatpush.bf16.msra.mxu2 %v308_v50  ;;  %v267_v50 = vlaneseq }
  0x18   :  { %v2395_v43 = vld [vmem:[#allocation3 + $0x80] sm:$0xf]  ;;  %v3392_v44 = vld [vmem:[#allocation3 + $0x8c] sm:$0xf0]  ;;  %v2796_v46 = vor.u32 %v3492_v38, %v2795_v36 }
  0x19   :  { %1374 = vmatpush.bf16.msrb.mxu0 %v2428_v25  ;;  %v2523_v45 = vld [vmem:[#allocation3 + $0x180] sm:$0xf]  ;;  %v3424_v47 = vld [vmem:[#allocation3 + $0x18c] sm:$0xf0]  ;;  %v2396_v53 = vor.u32 %v3392_v44, %v2395_v43 }
  0x1a   :  { %1387 = vmatpush.bf16.msrb.mxu1 %v2556_v29  ;;  %1413 = vmatpush.bf16.msrb.mxu3 %v2812_v33  ;;  %v2779_v48 = vld [vmem:[#allocation3 + $0x380] sm:$0xf]  ;;  %v3488_v49 = vld [vmem:[#allocation3 + $0x38c] sm:$0xf0]  ;;  %v2524_v55 = vor.u32 %v3424_v47, %v2523_v45 }
  0x1b   :  { %v2699_v51 = vld [vmem:[#allocation3 + $0x2e0] sm:$0xf]  ;;  %v3468_v52 = vld [vmem:[#allocation3 + $0x2ec] sm:$0xf0]  ;;  %v2780_v59 = vor.u32 %v3488_v49, %v2779_v48 }
  0x1c   :  { %v2700_v54 = vor.u32 %v3468_v52, %v2699_v51  ;;  %v2379_v56 = vld [vmem:[#allocation3 + $0x60] sm:$0xf]  ;;  %v3388_v57 = vld [vmem:[#allocation3 + $0x6c] sm:$0xf0]  ;;  %v268_v51 = vand.u32 127, %v267_v50 }
  0x1d   :  { %1375 = vmatpush.bf16.msrb.mxu0 %v2412_v37  ;;  %v2507_v58 = vld [vmem:[#allocation3 + $0x160] sm:$0xf]  ;;  %v3420_v60 = vld [vmem:[#allocation3 + $0x16c] sm:$0xf0]  ;;  %v2380_v2 = vor.u32 %v3388_v57, %v2379_v56  ;;  %v3402_v57 = vld [vmem:[#allocation3 + $0xe4] sm:$0xf] }
  0x1e   :  { %1388 = vmatpush.bf16.msrb.mxu1 %v2540_v41  ;;  %1414 = vmatpush.bf16.msrb.mxu3 %v2796_v46  ;;  %v2683_v61 = vld [vmem:[#allocation3 + $0x2c0] sm:$0xf]  ;;  %v3464_v62 = vld [vmem:[#allocation3 + $0x2cc] sm:$0xf0]  ;;  %v2508_v4 = vor.u32 %v3420_v60, %v2507_v58  ;;  %v2445_v58 = vld [vmem:[#allocation3 + $0xf0] sm:$0xf0] }
  0x1f   :  { %1399 = vmatpush.bf16.msrb.mxu2 %v2700_v54  ;;  %v2763_v63 = vld [vmem:[#allocation3 + $0x360] sm:$0xf]  ;;  %v3484_v0 = vld [vmem:[#allocation3 + $0x36c] sm:$0xf0]  ;;  %v2684_v1 = vor.u32 %v3464_v62, %v2683_v61  ;;  %v3710_v61 = vmov 0.0  }
  0x20   :  { %v2667_v3 = vld [vmem:[#allocation3 + $0x2a0] sm:$0xf]  ;;  %v3384_v6 = vld [vmem:[#allocation3 + $0x4c] sm:$0xf0]  ;;  %v2764_v8 = vor.u32 %v3484_v0, %v2763_v63 }
  0x21   :  { %1376 = vmatpush.bf16.msrb.mxu0 %v2396_v53  ;;  %v2363_v5 = vld [vmem:[#allocation3 + $0x40] sm:$0xf]  ;;  %v3460_v7 = vld [vmem:[#allocation3 + $0x2ac] sm:$0xf0] }
  0x22   :  { %1389 = vmatpush.bf16.msrb.mxu1 %v2524_v55  ;;  %1415 = vmatpush.bf16.msrb.mxu3 %v2780_v59  ;;  %v2491_v9 = vld [vmem:[#allocation3 + $0x140] sm:$0xf]  ;;  %v3416_v10 = vld [vmem:[#allocation3 + $0x14c] sm:$0xf0]  ;;  %v2668_v11 = vor.u32 %v3460_v7, %v2667_v3  ;;  %v2364_v14 = vor.u32 %v3384_v6, %v2363_v5  ;;  %v2448_v3 = vor.u32 %v3402_v57, %v2445_v58  ;;  %v3382_v57 = vld [vmem:[#allocation3 + $0x44] sm:$0xf] }
  0x23   :  { %1400 = vmatpush.bf16.msrb.mxu2 %v2684_v1  ;;  %v2747_v12 = vld [vmem:[#allocation3 + $0x340] sm:$0xf]  ;;  %v3480_v13 = vld [vmem:[#allocation3 + $0x34c] sm:$0xf0]  ;;  %v2492_v15 = vor.u32 %v3416_v10, %v2491_v9  ;;  %v2429_v9 = vld [vmem:[#allocation3 + $0xd0] sm:$0xf0] }
  0x24   :  { %v2748_v16 = vor.u32 %v3480_v13, %v2747_v12  ;;  %v2347_v17 = vld [vmem:[#allocation3 + $0x20] sm:$0xf]  ;;  %v3380_v18 = vld [vmem:[#allocation3 + $0x2c] sm:$0xf0]  ;;  %v2365_v58 = vld [vmem:[#allocation3 + $0x50] sm:$0xf0] }
  0x25   :  { %1377 = vmatpush.bf16.msrb.mxu0 %v2380_v2  ;;  %v2475_v19 = vld [vmem:[#allocation3 + $0x120] sm:$0xf]  ;;  %v2348_v20 = vor.u32 %v3380_v18, %v2347_v17  ;;  %v3412_v21 = vld [vmem:[#allocation3 + $0x12c] sm:$0xf0]  ;;  %v3394_v17 = vld [vmem:[#allocation3 + $0xa4] sm:$0xf] }
  0x26   :  { %1390 = vmatpush.bf16.msrb.mxu1 %v2508_v4  ;;  %1416 = vmatpush.bf16.msrb.mxu3 %v2764_v8  ;;  %v2731_v22 = vld [vmem:[#allocation3 + $0x320] sm:$0xf]  ;;  %v3476_v23 = vld [vmem:[#allocation3 + $0x32c] sm:$0xf0]  ;;  %v2476_v24 = vor.u32 %v3412_v21, %v2475_v19  ;;  %v3398_v8 = vld [vmem:[#allocation3 + $0xc4] sm:$0xf] }
  0x27   :  { %1401 = vmatpush.bf16.msrb.mxu2 %v2668_v11  ;;  %v2732_v25 = vor.u32 %v3476_v23, %v2731_v22  ;;  %v2651_v26 = vld [vmem:[#allocation3 + $0x280] sm:$0xf]  ;;  %v3456_v27 = vld [vmem:[#allocation3 + $0x28c] sm:$0xf0]  ;;  %v2432_v13 = vor.u32 %v3398_v8, %v2429_v9  ;;  %v2413_v18 = vld [vmem:[#allocation3 + $0xb0] sm:$0xf0] }
  0x28   :  { %v2652_v28 = vor.u32 %v3456_v27, %v2651_v26  ;;  %v2331_v29 = vld [vmem:[#allocation3] sm:$0xf]  ;;  %v3376_v30 = vld [vmem:[#allocation3 + $0xc] sm:$0xf0]  ;;  %v67_v23 = vld [vmem:[%s3902_s0 + $0x8] sm:$0xff] }
  0x29   :  { %1378 = vmatpush.bf16.msrb.mxu0 %v2364_v14  ;;  %v2459_v31 = vld [vmem:[#allocation3 + $0x100] sm:$0xf]  ;;  %v2332_v32 = vor.u32 %v3376_v30, %v2331_v29  ;;  %v3408_v33 = vld [vmem:[#allocation3 + $0x10c] sm:$0xf0]  ;;  %v2397_v29 = vld [vmem:[#allocation3 + $0x90] sm:$0xf0] }
  0x2a   :  { %1391 = vmatpush.bf16.msrb.mxu1 %v2492_v15  ;;  %1417 = vmatpush.bf16.msrb.mxu3 %v2748_v16  ;;  %v2715_v34 = vld [vmem:[#allocation3 + $0x300] sm:$0xf]  ;;  %v3472_v35 = vld [vmem:[#allocation3 + $0x30c] sm:$0xf0]  ;;  %v2460_v36 = vor.u32 %v3408_v33, %v2459_v31  ;;  %v372_v33 = vunpack.c.h.b16 %v67_v23  ;;  %v2541_v8 = vld [vmem:[#allocation3 + $0x1b0] sm:$0xf0] }
  0x2b   :  { %1402 = vmatpush.bf16.msrb.mxu2 %v2652_v28  ;;  %v2716_v37 = vor.u32 %v3472_v35, %v2715_v34  ;;  %v2635_v38 = vld [vmem:[#allocation3 + $0x260] sm:$0xf]  ;;  %v3452_v39 = vld [vmem:[#allocation3 + $0x26c] sm:$0xf0]  ;;  %v3390_v28 = vld [vmem:[#allocation3 + $0x84] sm:$0xf] }
  0x2c   :  { %v2636_v40 = vor.u32 %v3452_v39, %v2635_v38  ;;  %v2619_v41 = vld [vmem:[#allocation3 + $0x240] sm:$0xf]  ;;  %v3448_v42 = vld [vmem:[#allocation3 + $0x24c] sm:$0xf0]  ;;  %v2400_v38 = vor.u32 %v3390_v28, %v2397_v29 }
  0x2d   :  { %1379 = vmatpush.bf16.msrb.mxu0 %v2348_v20  ;;  %v2620_v43 = vor.u32 %v3448_v42, %v2619_v41  ;;  %v2603_v44 = vld [vmem:[#allocation3 + $0x220] sm:$0xf]  ;;  %v3444_v45 = vld [vmem:[#allocation3 + $0x22c] sm:$0xf0]  ;;  %v3386_v41 = vld [vmem:[#allocation3 + $0x64] sm:$0xf] }
  0x2e   :  { %1392 = vmatpush.bf16.msrb.mxu1 %v2476_v24  ;;  %1418 = vmatpush.bf16.msrb.mxu3 %v2732_v25  ;;  %v2604_v46 = vor.u32 %v3444_v45, %v2603_v44  ;;  %v2587_v47 = vld [vmem:[#allocation3 + $0x200] sm:$0xf]  ;;  %v3440_v48 = vld [vmem:[#allocation3 + $0x20c] sm:$0xf0]  ;;  %v2416_v24 = vor.u32 %v3394_v17, %v2413_v18  ;;  %v3434_v44 = vld [vmem:[#allocation3 + $0x1e4] sm:$0xf] }
  0x2f   :  { %1403 = vmatpush.bf16.msrb.mxu2 %v2636_v40  ;;  %v2588_v49 = vor.u32 %v3440_v48, %v2587_v47  ;;  %v2955_v52 = vld [vmem:[#allocation3 + $0x4e0] sm:$0xf]  ;;  %v3532_v53 = vld [vmem:[#allocation3 + $0x4ec] sm:$0xf0]  ;;  %v2573_v45 = vld [vmem:[#allocation3 + $0x1f0] sm:$0xf0]  ;;  %v3810_v48 = vpack.c.b16 %v372_v33, %v372_v33 }
  0x30   :  { %v3083_v55 = vld [vmem:[#allocation3 + $0x5e0] sm:$0xf]  ;;  %v3564_v56 = vld [vmem:[#allocation3 + $0x5ec] sm:$0xf0]  ;;  %v2956_v0 = vor.u32 %v3532_v53, %v2955_v52  ;;  %v3374_v18 = vld [vmem:[#allocation3 + $0x4] sm:$0xf] }
  0x31   :  { %1380 = vmatpush.bf16.msrb.mxu0 %v2332_v32  ;;  %v3099_v59 = vld [vmem:[#allocation3 + $0x600] sm:$0xf]  ;;  %v3568_v60 = vld [vmem:[#allocation3 + $0x60c] sm:$0xf0]  ;;  %v3084_v1 = vor.u32 %v3564_v56, %v3083_v55  ;;  %v371_v32 = vunpack.c.l.b16 %v67_v23  ;;  %v3466_v23 = vld [vmem:[#allocation3 + $0x2e4] sm:$0xf] }
  0x32   :  { %1393 = vmatpush.bf16.msrb.mxu1 %v2460_v36  ;;  %1419 = vmatpush.bf16.msrb.mxu3 %v2716_v37  ;;  %v2939_v2 = vld [vmem:[#allocation3 + $0x4c0] sm:$0xf]  ;;  %v3528_v4 = vld [vmem:[#allocation3 + $0x4cc] sm:$0xf0]  ;;  %v3100_v7 = vor.u32 %v3568_v60, %v3099_v59  ;;  %v3430_v59 = vld [vmem:[#allocation3 + $0x1c4] sm:$0xf] }
  0x33   :  { %1404 = vmatpush.bf16.msrb.mxu2 %v2620_v43  ;;  %v3067_v5 = vld [vmem:[#allocation3 + $0x5c0] sm:$0xf]  ;;  %v3560_v6 = vld [vmem:[#allocation3 + $0x5cc] sm:$0xf0]  ;;  %v2940_v10 = vor.u32 %v3528_v4, %v2939_v2  ;;  %v2381_v43 = vld [vmem:[#allocation3 + $0x70] sm:$0xf0]  ;;  %v3808_v47 = vpack.c.b16 %v371_v32, %v371_v32 }
  0x34   :  { %v3068_v11 = vor.u32 %v3560_v6, %v3067_v5  ;;  %v2923_v12 = vld [vmem:[#allocation3 + $0x4a0] sm:$0xf]  ;;  %v3524_v14 = vld [vmem:[#allocation3 + $0x4ac] sm:$0xf0]  ;;  %v2384_v53 = vor.u32 %v3386_v41, %v2381_v43  ;;  %v2557_v60 = vld [vmem:[#allocation3 + $0x1d0] sm:$0xf0] }
  0x35   :  { %v3051_v15 = vld [vmem:[#allocation3 + $0x5a0] sm:$0xf]  ;;  %v3556_v16 = vld [vmem:[#allocation3 + $0x5ac] sm:$0xf0]  ;;  %v2924_v20 = vor.u32 %v3524_v14, %v2923_v12  ;;  %v2560_v2 = vor.u32 %v3430_v59, %v2557_v60  ;;  %v3378_v5 = vld [vmem:[#allocation3 + $0x24] sm:$0xf] }
  0x36   :  { %v66_v19 = vld [vmem:[%s3902_s0] sm:$0xff]  ;;  %v3052_v21 = vor.u32 %v3556_v16, %v3051_v15  ;;  %v3520_v25 = vld [vmem:[#allocation3 + $0x48c] sm:$0xf0]  ;;  %v2349_v6 = vld [vmem:[#allocation3 + $0x30] sm:$0xf0] }
  0x37   :  { %1405 = vmatpush.bf16.msrb.mxu2 %v2604_v46  ;;  %v2907_v22 = vld [vmem:[#allocation3 + $0x480] sm:$0xf]  ;;  %v3552_v27 = vld [vmem:[#allocation3 + $0x58c] sm:$0xf0]  ;;  %v369_v30 = vunpack.c.l.b16 %v66_v19  ;;  %v370_v31 = vunpack.c.h.b16 %v66_v19  ;;  %v2352_v16 = vor.u32 %v3378_v5, %v2349_v6  ;;  %v2333_v19 = vld [vmem:[#allocation3 + $0x10] sm:$0xf0] }
  0x38   :  { %v3035_v26 = vld [vmem:[#allocation3 + $0x580] sm:$0xf]  ;;  %v2908_v34 = vor.u32 %v3520_v25, %v2907_v22  ;;  %v3516_v37 = vld [vmem:[#allocation3 + $0x46c] sm:$0xf0]  ;;  %v2525_v22 = vld [vmem:[#allocation3 + $0x190] sm:$0xf0]  ;;  %v2336_v33 = vor.u32 %v3374_v18, %v2333_v19 }
  0x39   :  { %v3036_v35 = vor.u32 %v3552_v27, %v3035_v26  ;;  %v2891_v36 = vld [vmem:[#allocation3 + $0x460] sm:$0xf]  ;;  %v3548_v40 = vld [vmem:[#allocation3 + $0x56c] sm:$0xf0]  ;;  %v3804_v42 = vpack.c.b16 %v369_v30, %v369_v30  ;;  %v3806_v46 = vpack.c.b16 %v370_v31, %v370_v31  ;;  %v3498_v25 = vld [vmem:[#allocation3 + $0x3e4] sm:$0xf] }
  0x3a   :  { %v3019_v39 = vld [vmem:[#allocation3 + $0x560] sm:$0xf]  ;;  %v3512_v52 = vld [vmem:[#allocation3 + $0x44c] sm:$0xf0]  ;;  %v2829_v26 = vld [vmem:[#allocation3 + $0x3f0] sm:$0xf0] }
  0x3b   :  { %1406 = vmatpush.bf16.msrb.mxu2 %v2588_v49  ;;  %v2892_v49 = vor.u32 %v3516_v37, %v2891_v36  ;;  %v3020_v50 = vor.u32 %v3548_v40, %v3019_v39  ;;  %v3003_v55 = vld [vmem:[#allocation3 + $0x540] sm:$0xf]  ;;  %v3544_v56 = vld [vmem:[#allocation3 + $0x54c] sm:$0xf0]  ;;  %v3530_v30 = vld [vmem:[#allocation3 + $0x4e4] sm:$0xf]  ;;  %v2832_v37 = vor.u32 %v3498_v25, %v2829_v26 }
  0x3c   :  { %v3540_v4 = vld [vmem:[#allocation3 + $0x52c] sm:$0xf0]  ;;  %v2843_v9 = vld [vmem:[#allocation3 + $0x400] sm:$0xf]  ;;  %v2957_v31 = vld [vmem:[#allocation3 + $0x4f0] sm:$0xf0] }
  0x3d   :  { %v3536_v14 = vld [vmem:[#allocation3 + $0x50c] sm:$0xf0]  ;;  %v2509_v39 = vld [vmem:[#allocation3 + $0x170] sm:$0xf0]  ;;  %v3462_v40 = vld [vmem:[#allocation3 + $0x2c4] sm:$0xf]  ;;  %v2960_v41 = vor.u32 %v3530_v30, %v2957_v31 }
  0x3e   :  { %v68_v15 = vld [vmem:[%s3902_s0 + $0x10] sm:$0xff]  ;;  %v3458_v59 = vld [vmem:[#allocation3 + $0x2a4] sm:$0xf] }
  0x3f   :  { %v373_v27 = vunpack.c.l.b16 %v68_v15  ;;  %v3410_v5 = vld [vmem:[#allocation3 + $0x124] sm:$0xf]  ;;  %v2477_v6 = vld [vmem:[#allocation3 + $0x130] sm:$0xf0] }
  0x40   :  { %v2461_v18 = vld [vmem:[#allocation3 + $0x110] sm:$0xf0]  ;;  %v3450_v19 = vld [vmem:[#allocation3 + $0x264] sm:$0xf] }
  0x41   :  { %v3822_v43 = vpack.c.b16 %v373_v27, %v373_v27  ;;  %v2893_v25 = vld [vmem:[#allocation3 + $0x470] sm:$0xf0]  ;;  %v3562_v26 = vld [vmem:[#allocation3 + $0x5e4] sm:$0xf] }
  0x42   :  { %v3085_v27 = vld [vmem:[#allocation3 + $0x5f0] sm:$0xf0]  ;;  %v3446_v31 = vld [vmem:[#allocation3 + $0x244] sm:$0xf] }
  0x80   :  { %v271_v54 = vpop.permute.xlu0 %270 }
  0x81   :  { %vm272_vm1 = vcmp.eq.s32.totalorder %v271_v54, %v268_v51  ;;  %v2875_v51 = vld [vmem:[#allocation3 + $0x440] sm:$0xf]  ;;  %v2576_v54 = vor.u32 %v3434_v44, %v2573_v45  ;;  %v2685_v44 = vld [vmem:[#allocation3 + $0x2d0] sm:$0xf0]  ;;  %v3494_v45 = vld [vmem:[#allocation3 + $0x3c4] sm:$0xf] }
  0x82   :  { %v2308_v62 = vsel %vm272_vm1, 1.0, %v3710_v61  ;;  %v2876_v61 = vor.u32 %v3512_v52, %v2875_v51  ;;  %v3526_v51 = vld [vmem:[#allocation3 + $0x4c4] sm:$0xf]  ;;  %v2941_v52 = vld [vmem:[#allocation3 + $0x4d0] sm:$0xf0] }
  0x83   :  { %v275_v63 = vpack.c.bf16 %v2308_v62, %v2308_v62  ;;  %v3004_v62 = vor.u32 %v3544_v56, %v3003_v55  ;;  %v2688_v55 = vor.u32 %v3462_v40, %v2685_v44  ;;  %v2944_v60 = vor.u32 %v3526_v51, %v2941_v52  ;;  %v3069_v40 = vld [vmem:[#allocation3 + $0x5d0] sm:$0xf0] }
  0x85   :  { %2325 = vmatmul.msk.bf16.vlgmr.msra.gmra.mxu0 %vm296_vm2, %v275_v63  ;;  %2326 = vmatmul.msk.bf16.vlgmr.msra.gmra.mxu1 %vm296_vm2, %v275_v63 }
  0x86   :  { %2327 = vmatmul.msk.bf16.vlgmr.msra.gmra.mxu2 %vm296_vm2, %v275_v63  ;;  %2328 = vmatmul.msk.bf16.vlgmr.msra.gmra.mxu3 %vm296_vm2, %v275_v63  ;;  %v2859_v63 = vld [vmem:[#allocation3 + $0x420] sm:$0xf] }
  0x87   :  { %1425 = vmatpush.bf16.msra.mxu0 %v2956_v0  ;;  %1438 = vmatpush.bf16.msra.mxu1 %v3084_v1  ;;  %v3508_v0 = vld [vmem:[#allocation3 + $0x42c] sm:$0xf0]  ;;  %v2368_v1 = vor.u32 %v3382_v57, %v2365_v58  ;;  %v3414_v57 = vld [vmem:[#allocation3 + $0x144] sm:$0xf]  ;;  %v2493_v58 = vld [vmem:[#allocation3 + $0x150] sm:$0xf0] }
  0x88   :  { %1464 = vmatpush.bf16.msra.mxu3 %v2448_v3  ;;  %1458 = vmatpush.bf16.msra.mxu2 %v3100_v7  ;;  %v2987_v3 = vld [vmem:[#allocation3 + $0x520] sm:$0xf]  ;;  %v3426_v7 = vld [vmem:[#allocation3 + $0x1a4] sm:$0xf] }
  0x89   :  { %v2988_v12 = vor.u32 %v3540_v4, %v2987_v3  ;;  %v2544_v17 = vor.u32 %v3426_v7, %v2541_v8  ;;  %v3454_v7 = vld [vmem:[#allocation3 + $0x284] sm:$0xf] }
  0x8b   :  { %1426 = vmatpush.bf16.msra.mxu0 %v2940_v10  ;;  %1439 = vmatpush.bf16.msra.mxu1 %v3068_v11  ;;  %v3504_v10 = vld [vmem:[#allocation3 + $0x40c] sm:$0xf0]  ;;  %v2860_v11 = vor.u32 %v3508_v0, %v2859_v63  ;;  %v2797_v63 = vld [vmem:[#allocation3 + $0x3b0] sm:$0xf0]  ;;  %v3522_v0 = vld [vmem:[#allocation3 + $0x4a4] sm:$0xf] }
  0x8c   :  { %1465 = vmatpush.bf16.msra.mxu3 %v2432_v13  ;;  %v2971_v13 = vld [vmem:[#allocation3 + $0x500] sm:$0xf]  ;;  %v2844_v28 = vor.u32 %v3504_v10, %v2843_v9  ;;  %v2653_v9 = vld [vmem:[#allocation3 + $0x290] sm:$0xf0]  ;;  %v3486_v10 = vld [vmem:[#allocation3 + $0x384] sm:$0xf] }
  0x8d   :  { %v2972_v29 = vor.u32 %v3536_v14, %v2971_v13  ;;  %v2909_v13 = vld [vmem:[#allocation3 + $0x490] sm:$0xf0]  ;;  %v2480_v14 = vor.u32 %v3410_v5, %v2477_v6  ;;  %v3550_v6 = vld [vmem:[#allocation3 + $0x584] sm:$0xf] }
  0x8e   :  { %v2845_v5 = vld [vmem:[#allocation3 + $0x410] sm:$0xf0] }
  0x8f   :  { %1427 = vmatpush.bf16.msra.mxu0 %v2924_v20  ;;  %1440 = vmatpush.bf16.msra.mxu1 %v3052_v21  ;;  %v69_v20 = vld [vmem:[%s3902_s0 + $0x18] sm:$0xf]  ;;  %v3422_v21 = vld [vmem:[#allocation3 + $0x184] sm:$0xf] }
  0x90   :  { %1466 = vmatpush.bf16.msra.mxu3 %v2416_v24  ;;  %v2701_v24 = vld [vmem:[#allocation3 + $0x2f0] sm:$0xf0]  ;;  %v375_v32 = vunpack.c.l.b16 %v69_v20 }
  0x91   :  { %v2704_v36 = vor.u32 %v3466_v23, %v2701_v24  ;;  %v2637_v20 = vld [vmem:[#allocation3 + $0x270] sm:$0xf0]  ;;  %v3514_v24 = vld [vmem:[#allocation3 + $0x464] sm:$0xf] }
  0x92   :  { %v2765_v23 = vld [vmem:[#allocation3 + $0x370] sm:$0xf0] }
  0x93   :  { %1428 = vmatpush.bf16.msra.mxu0 %v2908_v34  ;;  %1441 = vmatpush.bf16.msra.mxu1 %v3036_v35  ;;  %v2528_v34 = vor.u32 %v3422_v21, %v2525_v22  ;;  %v374_v35 = vunpack.c.h.b16 %v68_v15  ;;  %v3406_v15 = vld [vmem:[#allocation3 + $0x104] sm:$0xf] }
  0x94   :  { %1467 = vmatpush.bf16.msra.mxu3 %v2400_v38  ;;  %v3418_v38 = vld [vmem:[#allocation3 + $0x164] sm:$0xf] }
  0x95   :  { %1381 = vmatmul.bf16.vlgmr.msrb.gmra.mxu0 %v3804_v42  ;;  %1394 = vmatmul.bf16.vlgmr.msrb.gmra.mxu1 %v3806_v46  ;;  %v3482_v22 = vld [vmem:[#allocation3 + $0x364] sm:$0xf] }
  0x96   :  { %1407 = vmatmul.bf16.vlgmr.msrb.gmra.mxu2 %v3808_v47  ;;  %1420 = vmatmul.bf16.vlgmr.msrb.gmra.mxu3 %v3810_v48  ;;  %v2768_v30 = vor.u32 %v3482_v22, %v2765_v23  ;;  %v2579_v22 = vld [vmem:[#allocation3 + $0x1e8] sm:$0xf]  ;;  %v3437_v23 = vld [vmem:[#allocation3 + $0x1f4] sm:$0xf0] }
  0x97   :  { %1429 = vmatpush.bf16.msra.mxu0 %v2892_v49  ;;  %1442 = vmatpush.bf16.msra.mxu1 %v3020_v50  ;;  %v2813_v49 = vld [vmem:[#allocation3 + $0x3d0] sm:$0xf0]  ;;  %v3824_v50 = vpack.c.b16 %v375_v32, %v375_v32 }
  0x98   :  { %1468 = vmatpush.bf16.msra.mxu3 %v2384_v53  ;;  %1477 = vmatpush.bf16.msrb.mxu2 %v2576_v54  ;;  %v2512_v53 = vor.u32 %v3418_v38, %v2509_v39  ;;  %v3826_v54 = vpack.c.b16 %v374_v35, %v374_v35  ;;  %v2816_v56 = vor.u32 %v3494_v45, %v2813_v49  ;;  %v2621_v32 = vld [vmem:[#allocation3 + $0x250] sm:$0xf0]  ;;  %v3478_v35 = vld [vmem:[#allocation3 + $0x344] sm:$0xf] }
  0x99   :  { %v2877_v38 = vld [vmem:[#allocation3 + $0x450] sm:$0xf0]  ;;  %v3558_v39 = vld [vmem:[#allocation3 + $0x5c4] sm:$0xf] }
  0x9a   :  { %v3442_v45 = vld [vmem:[#allocation3 + $0x224] sm:$0xf]  ;;  %v2605_v49 = vld [vmem:[#allocation3 + $0x230] sm:$0xf0]  ;;  %v3072_v52 = vor.u32 %v3558_v39, %v3069_v40 }
  0x9b   :  { %1430 = vmatpush.bf16.msra.mxu0 %v2876_v61  ;;  %1443 = vmatpush.bf16.msra.mxu1 %v3004_v62  ;;  %v2669_v61 = vld [vmem:[#allocation3 + $0x2b0] sm:$0xf0]  ;;  %v3490_v62 = vld [vmem:[#allocation3 + $0x3a4] sm:$0xf] }
  0x9c   :  { %1469 = vmatpush.bf16.msra.mxu3 %v2368_v1  ;;  %1478 = vmatpush.bf16.msrb.mxu2 %v2560_v2  ;;  %v2925_v1 = vld [vmem:[#allocation3 + $0x4b0] sm:$0xf0]  ;;  %v2496_v2 = vor.u32 %v3414_v57, %v2493_v58  ;;  %v2672_v3 = vor.u32 %v3458_v59, %v2669_v61  ;;  %v2800_v4 = vor.u32 %v3490_v62, %v2797_v63  ;;  %v3554_v58 = vld [vmem:[#allocation3 + $0x5a4] sm:$0xf] }
  0x9d   :  { %v2928_v8 = vor.u32 %v3522_v0, %v2925_v1  ;;  %v2861_v57 = vld [vmem:[#allocation3 + $0x430] sm:$0xf0]  ;;  %v3438_v62 = vld [vmem:[#allocation3 + $0x204] sm:$0xf] }
  0x9e   :  { %v3053_v59 = vld [vmem:[#allocation3 + $0x5b0] sm:$0xf0]  ;;  %v3470_v0 = vld [vmem:[#allocation3 + $0x304] sm:$0xf] }
  0x9f   :  { %1431 = vmatpush.bf16.msra.mxu0 %v2860_v11  ;;  %1444 = vmatpush.bf16.msra.mxu1 %v2988_v12  ;;  %v2781_v11 = vld [vmem:[#allocation3 + $0x390] sm:$0xf0]  ;;  %v3518_v12 = vld [vmem:[#allocation3 + $0x484] sm:$0xf] }
  0xa0   :  { %1470 = vmatpush.bf16.msra.mxu3 %v2352_v16  ;;  %1479 = vmatpush.bf16.msrb.mxu2 %v2544_v17  ;;  %v2656_v16 = vor.u32 %v3454_v7, %v2653_v9  ;;  %v2784_v17 = vor.u32 %v3486_v10, %v2781_v11  ;;  %v2912_v21 = vor.u32 %v3518_v12, %v2909_v13  ;;  %v2589_v63 = vld [vmem:[#allocation3 + $0x210] sm:$0xf0]  ;;  %v3405_v9 = vld [vmem:[#allocation3 + $0xf4] sm:$0xf0]  ;;  %v3566_v10 = vld [vmem:[#allocation3 + $0x604] sm:$0xf] }
  0xa1   :  { %v3037_v7 = vld [vmem:[#allocation3 + $0x590] sm:$0xf0]  ;;  %v2592_v12 = vor.u32 %v3438_v62, %v2589_v63  ;;  %v2659_v62 = vld [vmem:[#allocation3 + $0x288] sm:$0xf]  ;;  %v3457_v63 = vld [vmem:[#allocation3 + $0x294] sm:$0xf0] }
  0xa2   :  { %v3101_v11 = vld [vmem:[#allocation3 + $0x610] sm:$0xf0] }
  0xa3   :  { %1432 = vmatpush.bf16.msra.mxu0 %v2844_v28  ;;  %1445 = vmatpush.bf16.msra.mxu1 %v2972_v29  ;;  %v2464_v28 = vor.u32 %v3406_v15, %v2461_v18  ;;  %v2640_v29 = vor.u32 %v3450_v19, %v2637_v20  ;;  %v3040_v15 = vor.u32 %v3550_v6, %v3037_v7  ;;  %v3469_v18 = vld [vmem:[#allocation3 + $0x2f4] sm:$0xf0] }
  0xa4   :  { %1471 = vmatpush.bf16.msra.mxu3 %v2336_v33  ;;  %1480 = vmatpush.bf16.msrb.mxu2 %v2528_v34  ;;  %v2896_v33 = vor.u32 %v3514_v24, %v2893_v25  ;;  %v3088_v34 = vor.u32 %v3562_v26, %v3085_v27  ;;  %v3104_v20 = vor.u32 %v3566_v10, %v3101_v11  ;;  %v2435_v24 = vld [vmem:[#allocation3 + $0xc8] sm:$0xf]  ;;  %v3401_v25 = vld [vmem:[#allocation3 + $0xd4] sm:$0xf0] }
  0xa5   :  { %v3501_v6 = vld [vmem:[#allocation3 + $0x3f4] sm:$0xf0]  ;;  %v2660_v7 = vor.u32 %v3457_v63, %v2659_v62  ;;  %v2515_v10 = vld [vmem:[#allocation3 + $0x168] sm:$0xf] }
  0xa6   :  { %1433 = vmatmul.bf16.vlgmr.msra.gmra.mxu0 %v3822_v43  ;;  %3113 = vmatmul.msk.bf16.vlgmr.msra.gmra.mxu2 %vm1369_vm3, %v3824_v50  ;;  %v3421_v11 = vld [vmem:[#allocation3 + $0x174] sm:$0xf0]  ;;  %v3091_v62 = vld [vmem:[#allocation3 + $0x5e8] sm:$0xf] }
  0xa7   :  { %1490 = vmatpush.bf16.msrb.mxu0 %v2704_v36  ;;  %1503 = vmatpush.bf16.msrb.mxu1 %v2832_v37  ;;  %v2749_v36 = vld [vmem:[#allocation3 + $0x350] sm:$0xf0]  ;;  %v3510_v37 = vld [vmem:[#allocation3 + $0x444] sm:$0xf]  ;;  %v3565_v63 = vld [vmem:[#allocation3 + $0x5f4] sm:$0xf0] }
  0xa8   :  { %1516 = vmatpush.bf16.msrb.mxu3 %v2960_v41  ;;  %1481 = vmatpush.bf16.msrb.mxu2 %v2512_v53  ;;  %v2624_v41 = vor.u32 %v3446_v31, %v2621_v32  ;;  %v2752_v44 = vor.u32 %v3478_v35, %v2749_v36  ;;  %v2880_v51 = vor.u32 %v3510_v37, %v2877_v38  ;;  %v3474_v53 = vld [vmem:[#allocation3 + $0x324] sm:$0xf]  ;;  %v3465_v31 = vld [vmem:[#allocation3 + $0x2d4] sm:$0xf0]  ;;  %v2419_v36 = vld [vmem:[#allocation3 + $0xa8] sm:$0xf] }
  0xa9   :  { %1472 = vmatmul.bf16.vlgmr.msra.gmra.mxu3 %v3804_v42  ;;  %1446 = vmatmul.bf16.vlgmr.msra.gmra.mxu1 %v3826_v54  ;;  %v2436_v32 = vor.u32 %v3401_v25, %v2435_v24  ;;  %v3433_v35 = vld [vmem:[#allocation3 + $0x1d4] sm:$0xf0] }
  0xaa   :  { %v3397_v37 = vld [vmem:[#allocation3 + $0xb4] sm:$0xf0] }
  0xab   :  { %1491 = vmatpush.bf16.msrb.mxu0 %v2688_v55  ;;  %1504 = vmatpush.bf16.msrb.mxu1 %v2816_v56  ;;  %v2733_v55 = vld [vmem:[#allocation3 + $0x330] sm:$0xf0]  ;;  %v3506_v56 = vld [vmem:[#allocation3 + $0x424] sm:$0xf] }
  0xac   :  { %1517 = vmatpush.bf16.msrb.mxu3 %v2944_v60  ;;  %1482 = vmatpush.bf16.msrb.mxu2 %v2496_v2  ;;  %v2608_v60 = vor.u32 %v3442_v45, %v2605_v49  ;;  %v2736_v61 = vor.u32 %v3474_v53, %v2733_v55  ;;  %v2864_v1 = vor.u32 %v3506_v56, %v2861_v57  ;;  %v3461_v45 = vld [vmem:[#allocation3 + $0x2b4] sm:$0xf0]  ;;  %v2403_v55 = vld [vmem:[#allocation3 + $0x88] sm:$0xf]  ;;  %v3534_v57 = vld [vmem:[#allocation3 + $0x504] sm:$0xf] }
  0xad   :  { %v3056_v2 = vor.u32 %v3554_v58, %v3053_v59  ;;  %v2420_v49 = vor.u32 %v3397_v37, %v2419_v36  ;;  %v3429_v53 = vld [vmem:[#allocation3 + $0x1b4] sm:$0xf0] }
  0xae   :  { %v3393_v56 = vld [vmem:[#allocation3 + $0x94] sm:$0xf0] }
  0xaf   :  { %1492 = vmatpush.bf16.msrb.mxu0 %v2672_v3  ;;  %1505 = vmatpush.bf16.msrb.mxu1 %v2800_v4  ;;  %v2717_v3 = vld [vmem:[#allocation3 + $0x310] sm:$0xf0]  ;;  %v3502_v4 = vld [vmem:[#allocation3 + $0x404] sm:$0xf] }
  0xb0   :  { %1518 = vmatpush.bf16.msrb.mxu3 %v2928_v8  ;;  %1483 = vmatpush.bf16.msrb.mxu2 %v2480_v14  ;;  %v2451_v8 = vld [vmem:[#allocation3 + $0xe8] sm:$0xf]  ;;  %v2720_v13 = vor.u32 %v3470_v0, %v2717_v3  ;;  %v2848_v14 = vor.u32 %v3502_v4, %v2845_v5  ;;  %v2404_v0 = vor.u32 %v3393_v56, %v2403_v55  ;;  %v3389_v4 = vld [vmem:[#allocation3 + $0x74] sm:$0xf0] }
  0xb1   :  { %v2452_v19 = vor.u32 %v3405_v9, %v2451_v8  ;;  %v2387_v3 = vld [vmem:[#allocation3 + $0x68] sm:$0xf] }
  0xb2   :  { %v2835_v5 = vld [vmem:[#allocation3 + $0x3e8] sm:$0xf] }
  0xb3   :  { %1493 = vmatpush.bf16.msrb.mxu0 %v2656_v16  ;;  %1506 = vmatpush.bf16.msrb.mxu1 %v2784_v17  ;;  %v3546_v16 = vld [vmem:[#allocation3 + $0x564] sm:$0xf]  ;;  %v2707_v17 = vld [vmem:[#allocation3 + $0x2e8] sm:$0xf] }
  0xb4   :  { %1519 = vmatpush.bf16.msrb.mxu3 %v2912_v21  ;;  %1484 = vmatpush.bf16.msrb.mxu2 %v2464_v28  ;;  %v3021_v21 = vld [vmem:[#allocation3 + $0x570] sm:$0xf0]  ;;  %v2708_v26 = vor.u32 %v3469_v18, %v2707_v17  ;;  %v2580_v28 = vor.u32 %v3437_v23, %v2579_v22  ;;  %v3385_v17 = vld [vmem:[#allocation3 + $0x54] sm:$0xf0]  ;;  %v2819_v18 = vld [vmem:[#allocation3 + $0x3c8] sm:$0xf] }
  0xb5   :  { %v3024_v27 = vor.u32 %v3546_v16, %v3021_v21  ;;  %v3453_v16 = vld [vmem:[#allocation3 + $0x274] sm:$0xf0]  ;;  %v2499_v21 = vld [vmem:[#allocation3 + $0x148] sm:$0xf] }
  0xb6   :  { %v3417_v22 = vld [vmem:[#allocation3 + $0x154] sm:$0xf0] }
  0xb7   :  { %1494 = vmatpush.bf16.msrb.mxu0 %v2640_v29  ;;  %1507 = vmatpush.bf16.msrb.mxu1 %v2768_v30  ;;  %v3542_v29 = vld [vmem:[#allocation3 + $0x544] sm:$0xf]  ;;  %v2691_v30 = vld [vmem:[#allocation3 + $0x2c8] sm:$0xf] }
  0xb8   :  { %1520 = vmatpush.bf16.msrb.mxu3 %v2896_v33  ;;  %1529 = vmatpush.bf16.msra.mxu2 %v3088_v34  ;;  %v3005_v33 = vld [vmem:[#allocation3 + $0x550] sm:$0xf0]  ;;  %v2563_v34 = vld [vmem:[#allocation3 + $0x1c8] sm:$0xf]  ;;  %v2692_v38 = vor.u32 %v3465_v31, %v2691_v30  ;;  %v3493_v31 = vld [vmem:[#allocation3 + $0x3b4] sm:$0xf0] }
  0xb9   :  { %1485 = vmatmul.bf16.vlgmr.msrb.gmra.mxu2 %v3806_v46  ;;  %v3008_v39 = vor.u32 %v3542_v29, %v3005_v33  ;;  %v2564_v40 = vor.u32 %v3433_v35, %v2563_v34  ;;  %v3381_v29 = vld [vmem:[#allocation3 + $0x34] sm:$0xf0]  ;;  %v2803_v30 = vld [vmem:[#allocation3 + $0x3a8] sm:$0xf] }
  0xba   :  { %v2483_v33 = vld [vmem:[#allocation3 + $0x128] sm:$0xf]  ;;  %v3413_v34 = vld [vmem:[#allocation3 + $0x134] sm:$0xf0]  ;;  %v2804_v37 = vor.u32 %v3493_v31, %v2803_v30  ;;  %v3431_v30 = vld [vmem:[#allocation3 + $0x1cc] sm:$0xf] }
  0xbb   :  { %1495 = vmatpush.bf16.msrb.mxu0 %v2624_v41  ;;  %1508 = vmatpush.bf16.msrb.mxu1 %v2752_v44  ;;  %v3538_v41 = vld [vmem:[#allocation3 + $0x524] sm:$0xf]  ;;  %v2675_v44 = vld [vmem:[#allocation3 + $0x2a8] sm:$0xf]  ;;  %v2565_v31 = vld [vmem:[#allocation3 + $0x1d8] sm:$0xf0] }
  0xbc   :  { %1521 = vmatpush.bf16.msrb.mxu3 %v2880_v51  ;;  %1530 = vmatpush.bf16.msra.mxu2 %v3072_v52  ;;  %v2989_v51 = vld [vmem:[#allocation3 + $0x530] sm:$0xf0]  ;;  %v2547_v52 = vld [vmem:[#allocation3 + $0x1a8] sm:$0xf]  ;;  %v2676_v58 = vor.u32 %v3461_v45, %v2675_v44  ;;  %v3489_v45 = vld [vmem:[#allocation3 + $0x394] sm:$0xf0] }
  0xbd   :  { %v2992_v59 = vor.u32 %v3538_v41, %v2989_v51  ;;  %v3377_v41 = vld [vmem:[#allocation3 + $0x14] sm:$0xf0]  ;;  %v2787_v44 = vld [vmem:[#allocation3 + $0x388] sm:$0xf] }
  0xbe   :  { %v3533_v51 = vld [vmem:[#allocation3 + $0x4f4] sm:$0xf0] }
  0xbf   :  { %1496 = vmatpush.bf16.msrb.mxu0 %v2608_v60  ;;  %1509 = vmatpush.bf16.msrb.mxu1 %v2736_v61  ;;  %v2548_v60 = vor.u32 %v3429_v53, %v2547_v52  ;;  %v2973_v61 = vld [vmem:[#allocation3 + $0x510] sm:$0xf0]  ;;  %v2484_v52 = vor.u32 %v3413_v34, %v2483_v33  ;;  %v2467_v53 = vld [vmem:[#allocation3 + $0x108] sm:$0xf] }
  0xc0   :  { %1522 = vmatpush.bf16.msrb.mxu3 %v2864_v1  ;;  %1531 = vmatpush.bf16.msra.mxu2 %v3056_v2  ;;  %v2531_v1 = vld [vmem:[#allocation3 + $0x188] sm:$0xf]  ;;  %v3425_v2 = vld [vmem:[#allocation3 + $0x194] sm:$0xf0]  ;;  %v2976_v8 = vor.u32 %v3534_v57, %v2973_v61  ;;  %v2788_v57 = vor.u32 %v3489_v45, %v2787_v44  ;;  %v2453_v44 = vld [vmem:[#allocation3 + $0xf8] sm:$0xf0]  ;;  %v2568_v45 = vor.u32 %v3431_v30, %v2565_v31 }
  0xc1   :  { %v2532_v9 = vor.u32 %v3425_v2, %v2531_v1  ;;  %v3529_v1 = vld [vmem:[#allocation3 + $0x4d4] sm:$0xf0]  ;;  %v2595_v2 = vld [vmem:[#allocation3 + $0x208] sm:$0xf] }
  0xc2   :  { %v2723_v34 = vld [vmem:[#allocation3 + $0x308] sm:$0xf] }
  0xc3   :  { %1497 = vmatpush.bf16.msrb.mxu0 %v2592_v12  ;;  %1510 = vmatpush.bf16.msrb.mxu1 %v2720_v13  ;;  %v2388_v12 = vor.u32 %v3389_v4, %v2387_v3  ;;  %v2836_v13 = vor.u32 %v3501_v6, %v2835_v5  ;;  %v3441_v3 = vld [vmem:[#allocation3 + $0x214] sm:$0xf0]  ;;  %v3107_v5 = vld [vmem:[#allocation3 + $0x608] sm:$0xf] }
  0xc4   :  { %1523 = vmatpush.bf16.msrb.mxu3 %v2848_v14  ;;  %1532 = vmatpush.bf16.msra.mxu2 %v3040_v15  ;;  %v2371_v14 = vld [vmem:[#allocation3 + $0x48] sm:$0xf]  ;;  %v3569_v6 = vld [vmem:[#allocation3 + $0x614] sm:$0xf0] }
  0xc5   :  { %v2643_v15 = vld [vmem:[#allocation3 + $0x268] sm:$0xf]  ;;  %v2372_v24 = vor.u32 %v3385_v17, %v2371_v14  ;;  %v2596_v14 = vor.u32 %v3441_v3, %v2595_v2  ;;  %v3108_v17 = vor.u32 %v3569_v6, %v3107_v5  ;;  %v3545_v6 = vld [vmem:[#allocation3 + $0x554] sm:$0xf0] }
  0xc6   :  { %1498 = vmatmul.bf16.vlgmr.msrb.gmra.mxu0 %v3808_v47  ;;  %1511 = vmatmul.bf16.vlgmr.msrb.gmra.mxu1 %v3810_v48  ;;  %v2644_v23 = vor.u32 %v3453_v16, %v2643_v15  ;;  %v2931_v15 = vld [vmem:[#allocation3 + $0x4a8] sm:$0xf]  ;;  %v3525_v16 = vld [vmem:[#allocation3 + $0x4b4] sm:$0xf0] }
  0xc7   :  { %1555 = vmatpush.bf16.msra.mxu1 %v2452_v19  ;;  %1524 = vmatmul.bf16.vlgmr.msrb.gmra.mxu3 %v3822_v43  ;;  %v3497_v19 = vld [vmem:[#allocation3 + $0x3d4] sm:$0xf0]  ;;  %v3011_v5 = vld [vmem:[#allocation3 + $0x548] sm:$0xf] }
  0xc8   :  { %1549 = vmatpush.bf16.msra.mxu3 %v3104_v20  ;;  %1581 = vmatpush.bf16.msra.mxu0 %v2708_v26  ;;  %v2516_v20 = vor.u32 %v3421_v11, %v2515_v10  ;;  %v2820_v25 = vor.u32 %v3497_v19, %v2819_v18  ;;  %v2355_v26 = vld [vmem:[#allocation3 + $0x28] sm:$0xf]  ;;  %v3481_v11 = vld [vmem:[#allocation3 + $0x354] sm:$0xf0]  ;;  %v3435_v18 = vld [vmem:[#allocation3 + $0x1ec] sm:$0xf] }
  0xc9   :  { %1533 = vmatpush.bf16.msra.mxu2 %v3024_v27  ;;  %v2627_v27 = vld [vmem:[#allocation3 + $0x248] sm:$0xf]  ;;  %v2356_v36 = vor.u32 %v3381_v29, %v2355_v26  ;;  %v2581_v19 = vld [vmem:[#allocation3 + $0x1f8] sm:$0xf0]  ;;  %v3557_v26 = vld [vmem:[#allocation3 + $0x5b4] sm:$0xf0] }
  0xca   :  { %v2584_v29 = vor.u32 %v3435_v18, %v2581_v19  ;;  %v3541_v18 = vld [vmem:[#allocation3 + $0x534] sm:$0xf0]  ;;  %v2851_v19 = vld [vmem:[#allocation3 + $0x408] sm:$0xf] }
  0xcb   :  { %1556 = vmatpush.bf16.msra.mxu1 %v2436_v32  ;;  %v2500_v32 = vor.u32 %v3417_v22, %v2499_v21  ;;  %v2739_v22 = vld [vmem:[#allocation3 + $0x328] sm:$0xf] }
  0xcc   :  { %1568 = vmatpush.bf16.msrb.mxu3 %v2580_v28  ;;  %1582 = vmatpush.bf16.msra.mxu0 %v2692_v38  ;;  %v3449_v28 = vld [vmem:[#allocation3 + $0x254] sm:$0xf0]  ;;  %v2339_v38 = vld [vmem:[#allocation3 + $0x8] sm:$0xf] }
  0xcd   :  { %1534 = vmatpush.bf16.msra.mxu2 %v3008_v39  ;;  %v2628_v35 = vor.u32 %v3449_v28, %v2627_v27  ;;  %v2611_v39 = vld [vmem:[#allocation3 + $0x228] sm:$0xf]  ;;  %v2340_v56 = vor.u32 %v3377_v41, %v2339_v38  ;;  %v3521_v28 = vld [vmem:[#allocation3 + $0x494] sm:$0xf0]  ;;  %v3403_v41 = vld [vmem:[#allocation3 + $0xec] sm:$0xf] }
  0xce   :  { %v2915_v27 = vld [vmem:[#allocation3 + $0x488] sm:$0xf]  ;;  %v3553_v38 = vld [vmem:[#allocation3 + $0x594] sm:$0xf0] }
  0xcf   :  { %1557 = vmatpush.bf16.msra.mxu1 %v2420_v49  ;;  %v2963_v49 = vld [vmem:[#allocation3 + $0x4e8] sm:$0xf] }
  0xd0   :  { %1569 = vmatpush.bf16.msrb.mxu3 %v2564_v40  ;;  %1583 = vmatpush.bf16.msra.mxu0 %v2676_v58  ;;  %v3445_v40 = vld [vmem:[#allocation3 + $0x234] sm:$0xf0]  ;;  %v2964_v61 = vor.u32 %v3533_v51, %v2963_v49  ;;  %v3427_v49 = vld [vmem:[#allocation3 + $0x1ac] sm:$0xf]  ;;  %v2549_v51 = vld [vmem:[#allocation3 + $0x1b8] sm:$0xf0] }
  0xd1   :  { %1535 = vmatpush.bf16.msra.mxu2 %v2992_v59  ;;  %v2612_v55 = vor.u32 %v3445_v40, %v2611_v39  ;;  %v3409_v58 = vld [vmem:[#allocation3 + $0x114] sm:$0xf0]  ;;  %v2771_v59 = vld [vmem:[#allocation3 + $0x368] sm:$0xf] }
  0xd2   :  { %v2468_v4 = vor.u32 %v3409_v58, %v2467_v53  ;;  %v2899_v39 = vld [vmem:[#allocation3 + $0x468] sm:$0xf]  ;;  %v3517_v40 = vld [vmem:[#allocation3 + $0x474] sm:$0xf0] }
  0xd3   :  { %1558 = vmatpush.bf16.msra.mxu1 %v2404_v0  ;;  %v2947_v0 = vld [vmem:[#allocation3 + $0x4c8] sm:$0xf]  ;;  %v3549_v58 = vld [vmem:[#allocation3 + $0x574] sm:$0xf0] }
  0xd4   :  { %1570 = vmatpush.bf16.msrb.mxu3 %v2548_v60  ;;  %1584 = vmatpush.bf16.msra.mxu0 %v2660_v7  ;;  %v3485_v60 = vld [vmem:[#allocation3 + $0x374] sm:$0xf0]  ;;  %v2948_v10 = vor.u32 %v3529_v1, %v2947_v0  ;;  %v3423_v0 = vld [vmem:[#allocation3 + $0x18c] sm:$0xf]  ;;  %v2533_v1 = vld [vmem:[#allocation3 + $0x198] sm:$0xf0] }
  0xd5   :  { %1536 = vmatpush.bf16.msra.mxu2 %v2976_v8  ;;  %v2772_v7 = vor.u32 %v3485_v60, %v2771_v59  ;;  %v3092_v8 = vor.u32 %v3565_v63, %v3091_v62  ;;  %v2883_v59 = vld [vmem:[#allocation3 + $0x448] sm:$0xf]  ;;  %v3513_v60 = vld [vmem:[#allocation3 + $0x454] sm:$0xf0]  ;;  %v2437_v62 = vld [vmem:[#allocation3 + $0xd8] sm:$0xf0]  ;;  %v2552_v63 = vor.u32 %v3427_v49, %v2549_v51 }
  0xd6   :  { %v2884_v3 = vor.u32 %v3513_v60, %v2883_v59  ;;  %v2677_v60 = vld [vmem:[#allocation3 + $0x2b8] sm:$0xf0] }
  0xd7   :  { %1559 = vmatpush.bf16.msra.mxu1 %v2388_v12  ;;  %3114 = vmatmul.msk.bf16.vlgmr.msra.gmra.mxu3 %vm1369_vm3, %v3824_v50  ;;  %v3075_v12 = vld [vmem:[#allocation3 + $0x5c8] sm:$0xf] }
  0xd8   :  { %1571 = vmatpush.bf16.msrb.mxu3 %v2532_v9  ;;  %1537 = vmatmul.bf16.vlgmr.msra.gmra.mxu2 %v3826_v54  ;;  %v2755_v9 = vld [vmem:[#allocation3 + $0x348] sm:$0xf] }
  0xd9   :  { %1594 = vmatpush.bf16.msrb.mxu2 %v2836_v13  ;;  %1585 = vmatpush.bf16.msra.mxu0 %v2644_v23  ;;  %v3561_v13 = vld [vmem:[#allocation3 + $0x5d4] sm:$0xf0]  ;;  %v2932_v23 = vor.u32 %v3525_v16, %v2931_v15  ;;  %v2995_v15 = vld [vmem:[#allocation3 + $0x528] sm:$0xf] }
  0xda   :  { %v3076_v21 = vor.u32 %v3561_v13, %v3075_v12  ;;  %v3419_v12 = vld [vmem:[#allocation3 + $0x16c] sm:$0xf]  ;;  %v2517_v13 = vld [vmem:[#allocation3 + $0x178] sm:$0xf0] }
  0xdb   :  { %1560 = vmatpush.bf16.msra.mxu1 %v2372_v24  ;;  %v3477_v24 = vld [vmem:[#allocation3 + $0x334] sm:$0xf0] }
  0xdc   :  { %1572 = vmatpush.bf16.msrb.mxu3 %v2516_v20  ;;  %v2756_v20 = vor.u32 %v3481_v11, %v2755_v9  ;;  %v3395_v9 = vld [vmem:[#allocation3 + $0xac] sm:$0xf]  ;;  %v2536_v11 = vor.u32 %v3423_v0, %v2533_v1  ;;  %v3093_v0 = vld [vmem:[#allocation3 + $0x5f8] sm:$0xf0] }
  0xdd   :  { %1595 = vmatpush.bf16.msrb.mxu2 %v2820_v25  ;;  %1586 = vmatpush.bf16.msra.mxu0 %v2628_v35  ;;  %v3059_v25 = vld [vmem:[#allocation3 + $0x5a8] sm:$0xf]  ;;  %v3473_v35 = vld [vmem:[#allocation3 + $0x314] sm:$0xf0] }
  0xde   :  { %v3060_v33 = vor.u32 %v3557_v26, %v3059_v25  ;;  %v2709_v25 = vld [vmem:[#allocation3 + $0x2f8] sm:$0xf0]  ;;  %v3415_v26 = vld [vmem:[#allocation3 + $0x14c] sm:$0xf] }
  0xdf   :  { %1561 = vmatpush.bf16.msra.mxu1 %v2356_v36  ;;  %v2916_v36 = vor.u32 %v3521_v28, %v2915_v27  ;;  %v2501_v27 = vld [vmem:[#allocation3 + $0x158] sm:$0xf0]  ;;  %v2996_v28 = vor.u32 %v3541_v18, %v2995_v15  ;;  %v3375_v18 = vld [vmem:[#allocation3 + $0xc] sm:$0xf] }
  0xe0   :  { %1573 = vmatpush.bf16.msrb.mxu3 %v2500_v32  ;;  %v2740_v32 = vor.u32 %v3477_v24, %v2739_v22  ;;  %v2405_v22 = vld [vmem:[#allocation3 + $0x98] sm:$0xf0]  ;;  %v2520_v24 = vor.u32 %v3419_v12, %v2517_v13 }
  0xe1   :  { %1596 = vmatpush.bf16.msrb.mxu2 %v2804_v37  ;;  %1587 = vmatpush.bf16.msra.mxu0 %v2612_v55  ;;  %v3043_v37 = vld [vmem:[#allocation3 + $0x588] sm:$0xf]  ;;  %v2900_v55 = vor.u32 %v3517_v40, %v2899_v39  ;;  %v2504_v39 = vor.u32 %v3415_v26, %v2501_v27  ;;  %v2693_v40 = vld [vmem:[#allocation3 + $0x2d8] sm:$0xf0] }
  0xe2   :  { %v3044_v53 = vor.u32 %v3553_v38, %v3043_v37  ;;  %v2837_v37 = vld [vmem:[#allocation3 + $0x3f8] sm:$0xf0]  ;;  %v3463_v38 = vld [vmem:[#allocation3 + $0x2cc] sm:$0xf] }
  0xe3   :  { %1562 = vmatpush.bf16.msra.mxu1 %v2340_v56  ;;  %v2456_v56 = vor.u32 %v3403_v41, %v2453_v44  ;;  %v3411_v41 = vld [vmem:[#allocation3 + $0x12c] sm:$0xf]  ;;  %v2485_v44 = vld [vmem:[#allocation3 + $0x138] sm:$0xf0] }
  0xe4   :  { %1574 = vmatpush.bf16.msrb.mxu3 %v2484_v52  ;;  %v2724_v52 = vor.u32 %v3473_v35, %v2723_v34  ;;  %v2389_v34 = vld [vmem:[#allocation3 + $0x78] sm:$0xf0]  ;;  %v2488_v59 = vor.u32 %v3411_v41, %v2485_v44  ;;  %v3527_v44 = vld [vmem:[#allocation3 + $0x4cc] sm:$0xf] }
  0xe5   :  { %1597 = vmatpush.bf16.msrb.mxu2 %v2788_v57  ;;  %1588 = vmatpush.bf16.msra.mxu0 %v2596_v14  ;;  %v3027_v57 = vld [vmem:[#allocation3 + $0x568] sm:$0xf]  ;;  %v3012_v14 = vor.u32 %v3545_v6, %v3011_v5  ;;  %v2357_v5 = vld [vmem:[#allocation3 + $0x38] sm:$0xf0]  ;;  %v3491_v6 = vld [vmem:[#allocation3 + $0x3ac] sm:$0xf] }
  0xe6   :  { %1563 = vmatmul.bf16.vlgmr.msra.gmra.mxu1 %v3804_v42  ;;  %v3028_v2 = vor.u32 %v3549_v58, %v3027_v57  ;;  %v2821_v57 = vld [vmem:[#allocation3 + $0x3d8] sm:$0xf0]  ;;  %v3459_v58 = vld [vmem:[#allocation3 + $0x2ac] sm:$0xf] }
  0xe7   :  { %1607 = vmatpush.bf16.msrb.mxu1 %v2964_v61  ;;  %v3399_v61 = vld [vmem:[#allocation3 + $0xcc] sm:$0xf]  ;;  %v2661_v12 = vld [vmem:[#allocation3 + $0x298] sm:$0xf0] }
  0xe8   :  { %1575 = vmatpush.bf16.msrb.mxu3 %v2468_v4  ;;  %1589 = vmatmul.bf16.vlgmr.msra.gmra.mxu0 %v3808_v47  ;;  %v2440_v4 = vor.u32 %v3399_v61, %v2437_v62  ;;  %v3407_v61 = vld [vmem:[#allocation3 + $0x10c] sm:$0xf]  ;;  %v2469_v62 = vld [vmem:[#allocation3 + $0x118] sm:$0xf0] }
  0xe9   :  { %1598 = vmatpush.bf16.msrb.mxu2 %v2772_v7  ;;  %1640 = vmatpush.bf16.msrb.mxu0 %v3108_v17  ;;  %v2867_v7 = vld [vmem:[#allocation3 + $0x428] sm:$0xf]  ;;  %v3077_v15 = vld [vmem:[#allocation3 + $0x5d8] sm:$0xf0] }
  0xea   :  { %v2965_v26 = vld [vmem:[#allocation3 + $0x4f8] sm:$0xf0] }
  0xeb   :  { %1608 = vmatpush.bf16.msrb.mxu1 %v2948_v10  ;;  %1576 = vmatmul.bf16.vlgmr.msrb.gmra.mxu3 %v3806_v46  ;;  %v2421_v10 = vld [vmem:[#allocation3 + $0xb8] sm:$0xf0] }
  0xec   :  { %1620 = vmatpush.bf16.msra.mxu3 %v3092_v8  ;;  %v3509_v8 = vld [vmem:[#allocation3 + $0x434] sm:$0xf0]  ;;  %v2424_v17 = vor.u32 %v3395_v9, %v2421_v10  ;;  %v2629_v41 = vld [vmem:[#allocation3 + $0x258] sm:$0xf0] }
  0xed   :  { %1599 = vmatpush.bf16.msrb.mxu2 %v2756_v20  ;;  %1659 = vmatpush.bf16.msra.mxu0 %v2584_v29  ;;  %v2868_v16 = vor.u32 %v3509_v8, %v2867_v7  ;;  %v3505_v20 = vld [vmem:[#allocation3 + $0x414] sm:$0xf0]  ;;  %v2979_v29 = vld [vmem:[#allocation3 + $0x508] sm:$0xf]  ;;  %v2805_v7 = vld [vmem:[#allocation3 + $0x3b8] sm:$0xf0]  ;;  %v2472_v8 = vor.u32 %v3407_v61, %v2469_v62 }
  0xee   :  { %v2852_v30 = vor.u32 %v3505_v20, %v2851_v19  ;;  %v2341_v19 = vld [vmem:[#allocation3 + $0x18] sm:$0xf0]  ;;  %v3523_v61 = vld [vmem:[#allocation3 + $0x4ac] sm:$0xf] }
  0xef   :  { %1609 = vmatpush.bf16.msrb.mxu1 %v2932_v23  ;;  %v3467_v23 = vld [vmem:[#allocation3 + $0x2ec] sm:$0xf]  ;;  %v2933_v62 = vld [vmem:[#allocation3 + $0x4b8] sm:$0xf0] }
  0xf0   :  { %1621 = vmatpush.bf16.msra.mxu3 %v3076_v21  ;;  %v3391_v21 = vld [vmem:[#allocation3 + $0x8c] sm:$0xf]  ;;  %v2712_v35 = vor.u32 %v3467_v23, %v2709_v25 }
  0xf1   :  { %1600 = vmatpush.bf16.msrb.mxu2 %v2740_v32  ;;  %1660 = vmatpush.bf16.msra.mxu0 %v2568_v45  ;;  %v2408_v31 = vor.u32 %v3391_v21, %v2405_v22  ;;  %v3537_v32 = vld [vmem:[#allocation3 + $0x514] sm:$0xf0]  ;;  %v3487_v21 = vld [vmem:[#allocation3 + $0x38c] sm:$0xf]  ;;  %v2789_v22 = vld [vmem:[#allocation3 + $0x398] sm:$0xf0] }
  0xf2   :  { %v2980_v45 = vor.u32 %v3537_v32, %v2979_v29  ;;  %v3451_v23 = vld [vmem:[#allocation3 + $0x26c] sm:$0xf]  ;;  %v3061_v29 = vld [vmem:[#allocation3 + $0x5b8] sm:$0xf0] }
  0xf3   :  { %1610 = vmatpush.bf16.msrb.mxu1 %v2916_v36  ;;  %v3499_v36 = vld [vmem:[#allocation3 + $0x3ec] sm:$0xf] }
  0xf4   :  { %1622 = vmatpush.bf16.msra.mxu3 %v3060_v33  ;;  %v3387_v33 = vld [vmem:[#allocation3 + $0x6c] sm:$0xf]  ;;  %v2840_v51 = vor.u32 %v3499_v36, %v2837_v37  ;;  %v2773_v37 = vld [vmem:[#allocation3 + $0x378] sm:$0xf0] }
  0xf5   :  { %1601 = vmatpush.bf16.msrb.mxu2 %v2724_v52  ;;  %1661 = vmatpush.bf16.msra.mxu0 %v2552_v63  ;;  %v2392_v49 = vor.u32 %v3387_v33, %v2389_v34  ;;  %v3383_v52 = vld [vmem:[#allocation3 + $0x4c] sm:$0xf] }
  0xf6   :  { %v3563_v63 = vld [vmem:[#allocation3 + $0x5ec] sm:$0xf] }
  0xf7   :  { %1611 = vmatpush.bf16.msrb.mxu1 %v2900_v55  ;;  %v2696_v55 = vor.u32 %v3463_v38, %v2693_v40  ;;  %v3096_v13 = vor.u32 %v3563_v63, %v3093_v0  ;;  %v3531_v25 = vld [vmem:[#allocation3 + $0x4ec] sm:$0xf]  ;;  %v3029_v0 = vld [vmem:[#allocation3 + $0x578] sm:$0xf0] }
  0xf8   :  { %1623 = vmatpush.bf16.msra.mxu3 %v3044_v53  ;;  %1602 = vmatmul.bf16.vlgmr.msrb.gmra.mxu2 %v3810_v48  ;;  %v2373_v53 = vld [vmem:[#allocation3 + $0x58] sm:$0xf0]  ;;  %v3483_v36 = vld [vmem:[#allocation3 + $0x36c] sm:$0xf] }
  0xf9   :  { %1646 = vmatpush.bf16.msra.mxu2 %v2456_v56  ;;  %1662 = vmatpush.bf16.msra.mxu0 %v2536_v11  ;;  %v3495_v56 = vld [vmem:[#allocation3 + $0x3cc] sm:$0xf]  ;;  %v2376_v1 = vor.u32 %v3383_v52, %v2373_v53  ;;  %v3045_v52 = vld [vmem:[#allocation3 + $0x598] sm:$0xf0]  ;;  %v2776_v53 = vor.u32 %v3483_v36, %v2773_v37  ;;  %v3605_v36 = vld [vmem:[#allocation5 + $0xf4] sm:$0xf0] }
  0xfa   :  { %3115 = vmatmul.msk.bf16.vlgmr.msrb.gmra.mxu0 %vm1369_vm3, %v3824_v50  ;;  %v3455_v11 = vld [vmem:[#allocation3 + $0x28c] sm:$0xf] }
  0xfb   :  { %1612 = vmatpush.bf16.msrb.mxu1 %v2884_v3  ;;  %v3379_v3 = vld [vmem:[#allocation3 + $0x2c] sm:$0xf]  ;;  %v2664_v20 = vor.u32 %v3455_v11, %v2661_v12  ;;  %v2597_v11 = vld [vmem:[#allocation3 + $0x218] sm:$0xf0] }
  0xfc   :  { %1624 = vmatpush.bf16.msra.mxu3 %v3028_v2  ;;  %v2824_v2 = vor.u32 %v3495_v56, %v2821_v57  ;;  %v3447_v38 = vld [vmem:[#allocation3 + $0x24c] sm:$0xf] }
  0xfd   :  { %1647 = vmatpush.bf16.msra.mxu2 %v2440_v4  ;;  %1663 = vmatpush.bf16.msra.mxu0 %v2520_v24  ;;  %v2680_v4 = vor.u32 %v3459_v58, %v2677_v60  ;;  %v2645_v24 = vld [vmem:[#allocation3 + $0x278] sm:$0xf0]  ;;  %v3479_v57 = vld [vmem:[#allocation3 + $0x34c] sm:$0xf] }
  0xfe   :  { %v2648_v34 = vor.u32 %v3451_v23, %v2645_v24  ;;  %v2757_v58 = vld [vmem:[#allocation3 + $0x358] sm:$0xf0] }
  0xff   :  { %1613 = vmatpush.bf16.msrb.mxu1 %v2868_v16  ;;  %v2360_v16 = vor.u32 %v3379_v3, %v2357_v5  ;;  %v2613_v60 = vld [vmem:[#allocation3 + $0x238] sm:$0xf0] }
 0x100   :  { %1625 = vmatpush.bf16.msra.mxu3 %v3012_v14  ;;  %v3559_v14 = vld [vmem:[#allocation3 + $0x5cc] sm:$0xf]  ;;  %v2725_v24 = vld [vmem:[#allocation3 + $0x318] sm:$0xf0] }
 0x101   :  { %1648 = vmatpush.bf16.msra.mxu2 %v2424_v17  ;;  %1664 = vmatpush.bf16.msra.mxu0 %v2504_v39  ;;  %v2808_v17 = vor.u32 %v3491_v6, %v2805_v7  ;;  %v3080_v27 = vor.u32 %v3559_v14, %v3077_v15  ;;  %v2936_v6 = vor.u32 %v3523_v61, %v2933_v62  ;;  %v2741_v7 = vld [vmem:[#allocation3 + $0x338] sm:$0xf0]  ;;  %v3519_v14 = vld [vmem:[#allocation3 + $0x48c] sm:$0xf] }
 0x102   :  { %v3848_v9 = vpop.f32.mrf.mxu0  ;;  %v3850_v10 = vpop.f32.mrf.mxu1  ;;  %v2917_v15 = vld [vmem:[#allocation3 + $0x498] sm:$0xf0] }
 0x103   :  { %1614 = vmatpush.bf16.msrb.mxu1 %v2852_v30  ;;  %v2344_v30 = vor.u32 %v3375_v18, %v2341_v19  ;;  %v3567_v18 = vld [vmem:[#allocation3 + $0x60c] sm:$0xf]  ;;  %v3109_v19 = vld [vmem:[#allocation3 + $0x618] sm:$0xf0]  ;;  %v2920_v23 = vor.u32 %v3519_v14, %v2917_v15  ;;  %v3151_v15 = vld [vmem:[#allocation5 + $0x40] sm:$0xf] }
 0x104   :  { %1626 = vmatpush.bf16.msra.mxu3 %v2996_v28  ;;  %v3555_v28 = vld [vmem:[#allocation3 + $0x5ac] sm:$0xf]  ;;  %v2853_v14 = vld [vmem:[#allocation3 + $0x418] sm:$0xf0] }
 0x105   :  { %1649 = vmatpush.bf16.msra.mxu2 %v2408_v31  ;;  %1665 = vmatpush.bf16.msra.mxu0 %v2488_v59  ;;  %v2792_v31 = vor.u32 %v3487_v21, %v2789_v22  ;;  %v3443_v59 = vld [vmem:[#allocation3 + $0x22c] sm:$0xf] }
 0x106   :  { %1615 = vmatmul.bf16.vlgmr.msrb.gmra.mxu1 %v3822_v43  ;;  %v2616_v5 = vor.u32 %v3443_v59, %v2613_v60  ;;  %v3471_v21 = vld [vmem:[#allocation3 + $0x30c] sm:$0xf]  ;;  %v2981_v59 = vld [vmem:[#allocation3 + $0x518] sm:$0xf0]  ;;  %v3231_v60 = vld [vmem:[#allocation5 + $0xe0] sm:$0xf] }
 0x107   :  { %1672 = vmatpush.bf16.msra.mxu1 %v2712_v35  ;;  %v2968_v35 = vor.u32 %v3531_v25, %v2965_v26  ;;  %v3515_v25 = vld [vmem:[#allocation3 + $0x46c] sm:$0xf]  ;;  %v2901_v26 = vld [vmem:[#allocation3 + $0x478] sm:$0xf0]  ;;  %v2728_v37 = vor.u32 %v3471_v21, %v2725_v24  ;;  %v3143_v24 = vld [vmem:[#allocation5 + $0x30] sm:$0xf] }
 0x108   :  { %1627 = vmatpush.bf16.msra.mxu3 %v2980_v45  ;;  %v2949_v45 = vld [vmem:[#allocation3 + $0x4d8] sm:$0xf0] }
 0x109   :  { %1650 = vmatpush.bf16.msra.mxu2 %v2392_v49  ;;  %1666 = vmatpush.bf16.msra.mxu0 %v2472_v8  ;;  %v3852_v32 = vpop.f32.mrf.mxu2  ;;  %v3854_v33 = vpop.f32.mrf.mxu3  ;;  %v3064_v49 = vor.u32 %v3555_v28, %v3061_v29  ;;  %v2952_v56 = vor.u32 %v3527_v44, %v2949_v45  ;;  %v3439_v8 = vld [vmem:[#allocation3 + $0x20c] sm:$0xf]  ;;  %v3589_v28 = vld [vmem:[#allocation5 + $0x74] sm:$0xf0] }
 0x10a   :  { %v324_v39 = vpop.f32.mrf.mxu0  ;;  %v337_v40 = vpop.f32.mrf.mxu1  ;;  %v2600_v22 = vor.u32 %v3439_v8, %v2597_v11  ;;  %v3511_v45 = vld [vmem:[#allocation3 + $0x44c] sm:$0xf] }
 0x10b   :  { %1673 = vmatpush.bf16.msra.mxu1 %v2696_v55  ;;  %1628 = vmatmul.bf16.vlgmr.msra.gmra.mxu3 %v3826_v54  ;;  %v2632_v55 = vor.u32 %v3447_v38, %v2629_v41  ;;  %v2904_v41 = vor.u32 %v3515_v25, %v2901_v26  ;;  %v3581_v25 = vld [vmem:[#allocation5 + $0x34] sm:$0xf0] }
 0x10c   :  { %1685 = vmatpush.bf16.msrb.mxu3 %v2840_v51  ;;  %1667 = vmatmul.bf16.vlgmr.msra.gmra.mxu0 %v3806_v46  ;;  %v3551_v51 = vld [vmem:[#allocation3 + $0x58c] sm:$0xf] }
 0x10d   :  { %1651 = vmatpush.bf16.msra.mxu2 %v2376_v1  ;;  %1711 = vmatpush.bf16.msrb.mxu0 %v3096_v13  ;;  %v3048_v63 = vor.u32 %v3551_v51, %v3045_v52  ;;  %v3547_v46 = vld [vmem:[#allocation3 + $0x56c] sm:$0xf]  ;;  %v2760_v1 = vor.u32 %v3479_v57, %v2757_v58 }
 0x10e   :  { %v3535_v57 = vld [vmem:[#allocation3 + $0x50c] sm:$0xf] }
 0x10f   :  { %1674 = vmatpush.bf16.msra.mxu1 %v2680_v4 }
 0x110   :  { %1686 = vmatpush.bf16.msrb.mxu3 %v2824_v2  ;;  %v3475_v2 = vld [vmem:[#allocation3 + $0x32c] sm:$0xf] }
 0x111   :  { %1652 = vmatpush.bf16.msra.mxu2 %v2360_v16  ;;  %1712 = vmatpush.bf16.msrb.mxu0 %v3080_v27  ;;  %v350_v3 = vpop.f32.mrf.mxu2  ;;  %v363_v4 = vpop.f32.mrf.mxu3  ;;  %v3543_v16 = vld [vmem:[#allocation3 + $0x54c] sm:$0xf]  ;;  %v3175_v27 = vld [vmem:[#allocation5 + $0x70] sm:$0xf] }
 0x112   :  { %v1382_v12 = vpop.f32.mrf.mxu0  ;;  %v1395_v13 = vpop.f32.mrf.mxu1  ;;  %v3176_v44 = vor.u32 %v3589_v28, %v3175_v27  ;;  %v2984_v3 = vor.u32 %v3535_v57, %v2981_v59  ;;  %v3207_v27 = vld [vmem:[#allocation5 + $0xb0] sm:$0xf]  ;;  %v3597_v28 = vld [vmem:[#allocation5 + $0xb4] sm:$0xf0]  ;;  %v3119_v59 = vld [vmem:[#allocation5] sm:$0xf] }
 0x113   :  { %1675 = vmatpush.bf16.msra.mxu1 %v2664_v20  ;;  %v2744_v20 = vor.u32 %v3475_v2, %v2741_v7  ;;  %v1383_v38 = vadd.f32 %v1382_v12, %v3848_v9  ;;  %v3603_v9 = vld [vmem:[#allocation5 + $0xe4] sm:$0xf0]  ;;  %v3585_v2 = vld [vmem:[#allocation5 + $0x54] sm:$0xf0] }
 0x114   :  { %1687 = vmatpush.bf16.msrb.mxu3 %v2808_v17  ;;  %v3013_v17 = vld [vmem:[#allocation3 + $0x558] sm:$0xf0]  ;;  %v3232_v4 = vor.u32 %v3603_v9, %v3231_v60  ;;  %v3601_v7 = vld [vmem:[#allocation5 + $0xd4] sm:$0xf0]  ;;  %v3575_v9 = vld [vmem:[#allocation5 + $0x4] sm:$0xf0] }
 0x115   :  { %1653 = vmatpush.bf16.msra.mxu2 %v2344_v30  ;;  %1713 = vmatpush.bf16.msrb.mxu0 %v3064_v49  ;;  %v3016_v29 = vor.u32 %v3543_v16, %v3013_v17  ;;  %v3539_v30 = vld [vmem:[#allocation3 + $0x52c] sm:$0xf]  ;;  %v2885_v49 = vld [vmem:[#allocation3 + $0x458] sm:$0xf0]  ;;  %v1396_v61 = vadd.f32 %v1395_v13, %v1383_v38  ;;  %v3593_v57 = vld [vmem:[#allocation5 + $0x94] sm:$0xf0] }
 0x116   :  { %v2888_v62 = vor.u32 %v3511_v45, %v2885_v49  ;;  %v3503_v13 = vld [vmem:[#allocation3 + $0x40c] sm:$0xf] }
 0x117   :  { %1676 = vmatpush.bf16.msra.mxu1 %v2648_v34  ;;  %v2997_v34 = vld [vmem:[#allocation3 + $0x538] sm:$0xf0] }
 0x118   :  { %1688 = vmatpush.bf16.msrb.mxu3 %v2792_v31  ;;  %1654 = vmatmul.bf16.vlgmr.msra.gmra.mxu2 %v3804_v42  ;;  %v3032_v42 = vor.u32 %v3547_v46, %v3029_v0  ;;  %v3112_v31 = vor.u32 %v3567_v18, %v3109_v19  ;;  %v3507_v46 = vld [vmem:[#allocation3 + $0x42c] sm:$0xf]  ;;  %v2869_v0 = vld [vmem:[#allocation3 + $0x438] sm:$0xf0]  ;;  %v3215_v19 = vld [vmem:[#allocation5 + $0xc0] sm:$0xf] }
 0x119   :  { %1698 = vmatpush.bf16.msrb.mxu2 %v2968_v35  ;;  %1714 = vmatpush.bf16.msrb.mxu0 %v3048_v63  ;;  %v3239_v35 = vld [vmem:[#allocation5 + $0xf0] sm:$0xf]  ;;  %v1408_v39 = vpop.f32.mrf.mxu2  ;;  %v1421_v40 = vpop.f32.mrf.mxu3  ;;  %v2872_v11 = vor.u32 %v3507_v46, %v2869_v0  ;;  %v3183_v46 = vld [vmem:[#allocation5 + $0x80] sm:$0xf]  ;;  %v3591_v0 = vld [vmem:[#allocation5 + $0x84] sm:$0xf0] }
 0x11a   :  { %v1384_v51 = vpop.f32.mrf.mxu0  ;;  %v1397_v52 = vpop.f32.mrf.mxu1  ;;  %v3240_v58 = vor.u32 %v3605_v36, %v3239_v35  ;;  %v3135_v36 = vld [vmem:[#allocation5 + $0x20] sm:$0xf] }
 0x11b   :  { %1677 = vmatpush.bf16.msra.mxu1 %v2632_v55  ;;  %v3587_v55 = vld [vmem:[#allocation5 + $0x64] sm:$0xf0]  ;;  %v3127_v51 = vld [vmem:[#allocation5 + $0x10] sm:$0xf]  ;;  %v3577_v52 = vld [vmem:[#allocation5 + $0x14] sm:$0xf0] }
 0x11c   :  { %1689 = vmatpush.bf16.msrb.mxu3 %v2776_v53  ;;  %v3167_v53 = vld [vmem:[#allocation5 + $0x60] sm:$0xf] }
 0x11d   :  { %1699 = vmatpush.bf16.msrb.mxu2 %v2952_v56  ;;  %1715 = vmatpush.bf16.msrb.mxu0 %v3032_v42  ;;  %v3000_v56 = vor.u32 %v3539_v30, %v2997_v34  ;;  %v3168_v63 = vor.u32 %v3587_v55, %v3167_v53  ;;  %v3583_v42 = vld [vmem:[#allocation5 + $0x44] sm:$0xf0] }
 0x11f   :  { %1678 = vmatpush.bf16.msra.mxu1 %v2616_v5  ;;  %v1409_v5 = vadd.f32 %v1408_v39, %v1396_v61  ;;  %v3588_v61 = vld [vmem:[#allocation5 + $0x74] sm:$0xf] }
 0x120   :  { %1690 = vmatpush.bf16.msrb.mxu3 %v2760_v1  ;;  %v3159_v1 = vld [vmem:[#allocation5 + $0x50] sm:$0xf] }
 0x121   :  { %1700 = vmatpush.bf16.msrb.mxu2 %v2936_v6  ;;  %1716 = vmatpush.bf16.msrb.mxu0 %v3016_v29  ;;  %v3223_v6 = vld [vmem:[#allocation5 + $0xd0] sm:$0xf]  ;;  %v1423_v8 = vpop.f32.mrf.mxu3  ;;  %v3160_v12 = vor.u32 %v3585_v2, %v3159_v1  ;;  %v1422_v17 = vadd.f32 %v1421_v40, %v1409_v5  ;;  %v3865_v29 = vld [vmem:[%s3906_s4] sm:$0xf]  ;;  %v3604_v1 = vld [vmem:[#allocation5 + $0xf4] sm:$0xf]  ;;  %v3184_v5 = vor.u32 %v3591_v0, %v3183_v46 }
 0x122   :  { %v3224_v16 = vor.u32 %v3601_v7, %v3223_v6  ;;  %v1739_v39 = vperm.slane %v3865_v29, 0  ;;  %v3241_v2 = vld [vmem:[#allocation5 + $0xf8] sm:$0xf0]  ;;  %v3586_v7 = vld [vmem:[#allocation5 + $0x64] sm:$0xf] }
 0x123   :  { %1679 = vmatpush.bf16.msra.mxu1 %v2600_v22  ;;  %v1434_v18 = vpop.f32.mrf.mxu0  ;;  %v2856_v22 = vor.u32 %v3503_v13, %v2853_v14  ;;  %v3244_v8 = vor.u32 %v3604_v1, %v3241_v2  ;;  %v3615_v46 = vld [vmem:[#allocation5 + $0x144] sm:$0xf0]  ;;  %v3592_v0 = vld [vmem:[#allocation5 + $0x94] sm:$0xf]  ;;  %v3193_v1 = vld [vmem:[#allocation5 + $0x98] sm:$0xf0] }
 0x124   :  { %1691 = vmatpush.bf16.msrb.mxu3 %v2744_v20  ;;  %v3599_v20 = vld [vmem:[#allocation5 + $0xc4] sm:$0xf0] }
 0x125   :  { %1701 = vmatpush.bf16.msrb.mxu2 %v2920_v23  ;;  %1717 = vmatpush.bf16.msrb.mxu0 %v3000_v56  ;;  %v3152_v23 = vor.u32 %v3583_v42, %v3151_v15  ;;  %v3216_v26 = vor.u32 %v3599_v20, %v3215_v19  ;;  %v3191_v56 = vld [vmem:[#allocation5 + $0x90] sm:$0xf]  ;;  %v3584_v42 = vld [vmem:[#allocation5 + $0x54] sm:$0xf]  ;;  %v3225_v19 = vld [vmem:[#allocation5 + $0xd8] sm:$0xf0] }
 0x126   :  { %1680 = vmatmul.bf16.vlgmr.msra.gmra.mxu1 %v3808_v47  ;;  %v1410_v47 = vpop.f32.mrf.mxu2  ;;  %v1447_v21 = vpop.f32.mrf.mxu1 }
 0x127   :  { %1731 = vmatpush.bf16.msrb.mxu1 %v3112_v31  ;;  %v3144_v31 = vor.u32 %v3581_v25, %v3143_v24  ;;  %v3169_v47 = vld [vmem:[#allocation5 + $0x68] sm:$0xf0] }
 0x128   :  { %1692 = vmatpush.bf16.msrb.mxu3 %v2728_v37  ;;  %v3208_v37 = vor.u32 %v3597_v28, %v3207_v27  ;;  %v3172_v15 = vor.u32 %v3586_v7, %v3169_v47  ;;  %v3217_v24 = vld [vmem:[#allocation5 + $0xc8] sm:$0xf0]  ;;  %v3196_v47 = vor.u32 %v3592_v0, %v3193_v1  ;;  %v3273_v0 = vld [vmem:[#allocation5 + $0x138] sm:$0xf0] }
 0x129   :  { %1702 = vmatpush.bf16.msrb.mxu2 %v2904_v41  ;;  %1718 = vmatpush.bf16.msrb.mxu0 %v2984_v3  ;;  %v3199_v41 = vld [vmem:[#allocation5 + $0xa0] sm:$0xf]  ;;  %v3120_v3 = vor.u32 %v3575_v9, %v3119_v59  ;;  %v3287_v9 = vld [vmem:[#allocation5 + $0x150] sm:$0xf]  ;;  %v3121_v7 = vld [vmem:[#allocation5 + $0x8] sm:$0xf0] }
 0x12b   :  { %2170 = vmatpush.bf16.msra.mxu1 %v3240_v58  ;;  %1693 = vmatmul.bf16.vlgmr.msrb.gmra.mxu3 %v3810_v48  ;;  %v1435_v48 = vadd.f32 %v1434_v18, %v1422_v17  ;;  %v1436_v40 = vpop.f32.mrf.mxu0  ;;  %v3128_v58 = vor.u32 %v3577_v52, %v3127_v51  ;;  %v3600_v18 = vld [vmem:[#allocation5 + $0xd4] sm:$0xf] }
 0x12c   :  { %2157 = vmatpush.bf16.msra.mxu3 %v3176_v44  ;;  %1719 = vmatmul.bf16.vlgmr.msrb.gmra.mxu0 %v3826_v54  ;;  %v3867_v35 = vpop.f32.mrf.mxu3  ;;  %v3579_v54 = vld [vmem:[#allocation5 + $0x24] sm:$0xf0] }
 0x12d   :  { %1703 = vmatpush.bf16.msrb.mxu2 %v2888_v62  ;;  %v1448_v30 = vadd.f32 %v1447_v21, %v1435_v48  ;;  %v3595_v44 = vld [vmem:[#allocation5 + $0xa4] sm:$0xf0]  ;;  %v3136_v45 = vor.u32 %v3579_v54, %v3135_v36  ;;  %v3582_v48 = vld [vmem:[#allocation5 + $0x44] sm:$0xf]  ;;  %v3153_v21 = vld [vmem:[#allocation5 + $0x48] sm:$0xf0]  ;;  %v1474_v2 = vadd.f32 %v3867_v35, %v3850_v10 }
 0x12e   :  { %v1460_v34 = vpop.f32.mrf.mxu2  ;;  %v1449_v49 = vpop.f32.mrf.mxu1  ;;  %v3200_v53 = vor.u32 %v3595_v44, %v3199_v41  ;;  %v3156_v27 = vor.u32 %v3582_v48, %v3153_v21  ;;  %v3145_v36 = vld [vmem:[#allocation5 + $0x38] sm:$0xf0]  ;;  %v3295_v41 = vld [vmem:[#allocation5 + $0x160] sm:$0xf]  ;;  %v3619_v44 = vld [vmem:[#allocation5 + $0x164] sm:$0xf0] }
 0x12f   :  { %2171 = vmatpush.bf16.msra.mxu1 %v3232_v4  ;;  %v1461_v38 = vadd.f32 %v1460_v34, %v1448_v30  ;;  %v3303_v30 = vld [vmem:[#allocation5 + $0x170] sm:$0xf]  ;;  %v3580_v34 = vld [vmem:[#allocation5 + $0x34] sm:$0xf]  ;;  %v3137_v49 = vld [vmem:[#allocation5 + $0x28] sm:$0xf0]  ;;  %v3296_v52 = vor.u32 %v3619_v44, %v3295_v41 }
 0x130   :  { %2158 = vmatpush.bf16.msra.mxu3 %v3168_v63  ;;  %v3148_v40 = vor.u32 %v3580_v34, %v3145_v36  ;;  %v3607_v34 = vld [vmem:[#allocation5 + $0x104] sm:$0xf0]  ;;  %v3620_v36 = vld [vmem:[#allocation5 + $0x174] sm:$0xf] }
 0x131   :  { %1704 = vmatpush.bf16.msrb.mxu2 %v2872_v11  ;;  %v1747_v55 = vadd.f32 %v1739_v39, %v1461_v38  ;;  %v3602_v11 = vld [vmem:[#allocation5 + $0xe4] sm:$0xf]  ;;  %v3596_v38 = vld [vmem:[#allocation5 + $0xb4] sm:$0xf]  ;;  %v3209_v39 = vld [vmem:[#allocation5 + $0xb8] sm:$0xf0] }
 0x132   :  { %v3212_v51 = vor.u32 %v3596_v38, %v3209_v39 }
 0x133   :  { %2172 = vmatpush.bf16.msra.mxu1 %v3224_v16  ;;  %v1755_v63 = vmul.f32 0.2, %v1747_v55  ;;  %vm1751_vm4 = vcmp.gt.f32.partialorder %v1747_v55, 0.0  ;;  %v3161_v16 = vld [vmem:[#allocation5 + $0x58] sm:$0xf0] }
 0x134   :  { %2159 = vmatpush.bf16.msra.mxu3 %v3160_v12  ;;  %v1475_v62 = vpop.f32.mrf.mxu3  ;;  %v3233_v12 = vld [vmem:[#allocation5 + $0xe8] sm:$0xf0]  ;;  %v3164_v20 = vor.u32 %v3584_v42, %v3161_v16  ;;  %v3271_v16 = vld [vmem:[#allocation5 + $0x130] sm:$0xf] }
 0x135   :  { %1705 = vmatpush.bf16.msrb.mxu2 %v2856_v22  ;;  %v1759_v6 = vsel %vm1751_vm4, %v1747_v55, %v1755_v63  ;;  %v3236_v17 = vor.u32 %v3602_v11, %v3233_v12  ;;  %v3228_v22 = vor.u32 %v3600_v18, %v3225_v19  ;;  %v3594_v55 = vld [vmem:[#allocation5 + $0xa4] sm:$0xf]  ;;  %v3279_v63 = vld [vmem:[#allocation5 + $0x140] sm:$0xf]  ;;  %v3185_v12 = vld [vmem:[#allocation5 + $0x88] sm:$0xf0] }
 0x136   :  { %3116 = vmatmul.msk.bf16.vlgmr.msrb.gmra.mxu1 %vm1369_vm3, %v3824_v50  ;;  %v1462_v60 = vpop.f32.mrf.mxu2  ;;  %v3192_v50 = vor.u32 %v3593_v57, %v3191_v56  ;;  %v3873_v13 = vpack.c.bf16 %v1759_v6, %v1759_v6  ;;  %v3201_v56 = vld [vmem:[#allocation5 + $0xa8] sm:$0xf0]  ;;  %v3574_v6 = vld [vmem:[#allocation5 + $0x4] sm:$0xf]  ;;  %v3611_v19 = vld [vmem:[#allocation5 + $0x124] sm:$0xf0] }
 0x137   :  { %2173 = vmatpush.bf16.msra.mxu1 %v3216_v26  ;;  %v3576_v60 = vld [vmem:[#allocation5 + $0x14] sm:$0xf]  ;;  %v3204_v62 = vor.u32 %v3594_v55, %v3201_v56  ;;  %v3590_v11 = vld [vmem:[#allocation5 + $0x84] sm:$0xf]  ;;  %v3124_v42 = vor.u32 %v3574_v6, %v3121_v7  ;;  %v3265_v7 = vld [vmem:[#allocation5 + $0x128] sm:$0xf0] }
 0x138   :  { %2160 = vmatpush.bf16.msra.mxu3 %v3152_v23  ;;  %1706 = vmatmul.bf16.vlgmr.msrb.gmra.mxu2 %v3822_v43  ;;  %v3177_v43 = vld [vmem:[#allocation5 + $0x78] sm:$0xf0]  ;;  %v3598_v23 = vld [vmem:[#allocation5 + $0xc4] sm:$0xf]  ;;  %v3188_v10 = vor.u32 %v3590_v11, %v3185_v12  ;;  %v3616_v56 = vld [vmem:[#allocation5 + $0x154] sm:$0xf] }
 0x139   :  { %v3180_v4 = vor.u32 %v3588_v61, %v3177_v43  ;;  %v3220_v54 = vor.u32 %v3598_v23, %v3217_v24  ;;  %v3617_v61 = vld [vmem:[#allocation5 + $0x154] sm:$0xf0]  ;;  %v3129_v43 = vld [vmem:[#allocation5 + $0x18] sm:$0xf0]  ;;  %v1740_v24 = vperm.slane %v3865_v29, 1 }
 0x13a   :  { %v3610_v6 = vld [vmem:[#allocation5 + $0x124] sm:$0xf]  ;;  %v3351_v11 = vld [vmem:[#allocation5 + $0x1d0] sm:$0xf]  ;;  %v3633_v12 = vld [vmem:[#allocation5 + $0x1d4] sm:$0xf0] }
 0x13b   :  { %2174 = vmatpush.bf16.msra.mxu1 %v3208_v37 }
 0x13c   :  { %2161 = vmatpush.bf16.msra.mxu3 %v3144_v31  ;;  %v3621_v31 = vld [vmem:[#allocation5 + $0x174] sm:$0xf0] }
 0x13d   :  { %v3304_v37 = vor.u32 %v3621_v31, %v3303_v30  ;;  %v3247_v31 = vld [vmem:[#allocation5 + $0x100] sm:$0xf] }
 0x13e   :  { %v3875_v14 = vpop.f32.mrf.mxu2 }
 0x13f   :  { %2175 = vmatpush.bf16.msra.mxu1 %v3200_v53  ;;  %2183 = vmatpush.bf16.msra.mxu2 %v3304_v37  ;;  %v3305_v37 = vld [vmem:[#allocation5 + $0x178] sm:$0xf0] }
 0x140   :  { %2162 = vmatpush.bf16.msra.mxu3 %v3136_v45  ;;  %v3578_v45 = vld [vmem:[#allocation5 + $0x24] sm:$0xf] }
 0x141   :  { %v3140_v59 = vor.u32 %v3578_v45, %v3137_v49  ;;  %v3618_v49 = vld [vmem:[#allocation5 + $0x164] sm:$0xf] }
 0x143   :  { %2176 = vmatpush.bf16.msra.mxu1 %v3192_v50  ;;  %v1499_v25 = vpop.f32.mrf.mxu0  ;;  %v3878_v26 = vpop.f32.mrf.mxu1  ;;  %2184 = vmatpush.bf16.msra.mxu2 %v3296_v52  ;;  %v3288_v50 = vor.u32 %v3617_v61, %v3287_v9  ;;  %v3281_v9 = vld [vmem:[#allocation5 + $0x148] sm:$0xf0] }
 0x144   :  { %2163 = vmatpush.bf16.msra.mxu3 %v3128_v58 }
 0x146   :  { %v1488_v28 = vpop.f32.mrf.mxu2 }
 0x147   :  { %2177 = vmatpush.bf16.msra.mxu1 %v3184_v5  ;;  %2185 = vmatpush.bf16.msra.mxu2 %v3288_v50  ;;  %v1487_v5 = vadd.f32 %v3875_v14, %v1474_v2  ;;  %v3263_v14 = vld [vmem:[#allocation5 + $0x120] sm:$0xf]  ;;  %v3637_v50 = vld [vmem:[#allocation5 + $0x1f4] sm:$0xf0] }
 0x148   :  { %2164 = vmatpush.bf16.msra.mxu3 %v3120_v3  ;;  %v3280_v3 = vor.u32 %v3615_v46, %v3279_v63  ;;  %v3264_v48 = vor.u32 %v3611_v19, %v3263_v14  ;;  %v3612_v46 = vld [vmem:[#allocation5 + $0x134] sm:$0xf]  ;;  %v3631_v14 = vld [vmem:[#allocation5 + $0x1c4] sm:$0xf0]  ;;  %v3606_v19 = vld [vmem:[#allocation5 + $0x104] sm:$0xf] }
 0x149   :  { %v3276_v2 = vor.u32 %v3612_v46, %v3273_v0  ;;  %v3632_v0 = vld [vmem:[#allocation5 + $0x1d4] sm:$0xf] }
 0x14a   :  { %v1525_v53 = vpop.f32.mrf.mxu3 }
 0x14b   :  { %2222 = vmatpush.bf16.msrb.mxu1 %v3244_v8  ;;  %2165 = vmatmul.bf16.vlgmr.msra.gmra.mxu3 %v3873_v13  ;;  %v1514_v57 = vpop.f32.mrf.mxu1  ;;  %v1501_v58 = vpop.f32.mrf.mxu0 }
 0x14c   :  { %2209 = vmatpush.bf16.msrb.mxu3 %v3180_v4  ;;  %v3132_v4 = vor.u32 %v3576_v60, %v3129_v43  ;;  %2186 = vmatpush.bf16.msra.mxu2 %v3280_v3  ;;  %v3289_v57 = vld [vmem:[#allocation5 + $0x158] sm:$0xf0]  ;;  %v3614_v60 = vld [vmem:[#allocation5 + $0x144] sm:$0xf]  ;;  %v3359_v3 = vld [vmem:[#allocation5 + $0x1e0] sm:$0xf] }
 0x14d   :  { %v3284_v61 = vor.u32 %v3614_v60, %v3281_v9 }
 0x14f   :  { %2223 = vmatpush.bf16.msrb.mxu1 %v3236_v17  ;;  %v3613_v17 = vld [vmem:[#allocation5 + $0x134] sm:$0xf0] }
 0x150   :  { %2210 = vmatpush.bf16.msrb.mxu3 %v3172_v15  ;;  %v1500_v15 = vadd.f32 %v1499_v25, %v1487_v5  ;;  %v3272_v35 = vor.u32 %v3613_v17, %v3271_v16  ;;  %v3255_v25 = vld [vmem:[#allocation5 + $0x110] sm:$0xf]  ;;  %v3608_v16 = vld [vmem:[#allocation5 + $0x114] sm:$0xf]  ;;  %v3257_v17 = vld [vmem:[#allocation5 + $0x118] sm:$0xf0] }
 0x152   :  { %v1527_v8 = vpop.f32.mrf.mxu3  ;;  %v1513_v18 = vadd.f32 %v3878_v26, %v1500_v15  ;;  %2187 = vmatpush.bf16.msra.mxu2 %v3272_v35 }
 0x153   :  { %2224 = vmatpush.bf16.msrb.mxu1 %v3228_v22 }
 0x154   :  { %2211 = vmatpush.bf16.msrb.mxu3 %v3164_v20  ;;  %v1526_v20 = vadd.f32 %v1525_v53, %v1513_v18  ;;  %v3343_v18 = vld [vmem:[#allocation5 + $0x1c0] sm:$0xf] }
 0x156   :  { %2188 = vmatpush.bf16.msra.mxu2 %v3264_v48  ;;  %v3249_v48 = vld [vmem:[#allocation5 + $0x108] sm:$0xf0] }
 0x157   :  { %2225 = vmatpush.bf16.msrb.mxu1 %v3220_v54  ;;  %v3248_v54 = vor.u32 %v3607_v34, %v3247_v31  ;;  %v3627_v34 = vld [vmem:[#allocation5 + $0x1a4] sm:$0xf0] }
 0x158   :  { %2212 = vmatpush.bf16.msrb.mxu3 %v3156_v27  ;;  %v3609_v27 = vld [vmem:[#allocation5 + $0x114] sm:$0xf0] }
 0x159   :  { %v3256_v30 = vor.u32 %v3609_v27, %v3255_v25  ;;  %v3252_v25 = vor.u32 %v3606_v19, %v3249_v48  ;;  %v3313_v48 = vld [vmem:[#allocation5 + $0x188] sm:$0xf0] }
 0x15a   :  { %v1551_v22 = vpop.f32.mrf.mxu3 }
 0x15b   :  { %2226 = vmatpush.bf16.msrb.mxu1 %v3212_v51  ;;  %v1538_v21 = vpop.f32.mrf.mxu2  ;;  %2189 = vmatpush.bf16.msra.mxu2 %v3256_v30  ;;  %v3297_v51 = vld [vmem:[#allocation5 + $0x168] sm:$0xf0] }
 0x15c   :  { %2213 = vmatpush.bf16.msrb.mxu3 %v3148_v40  ;;  %v1539_v23 = vadd.f32 %v1538_v21, %v1526_v20  ;;  %v3308_v40 = vor.u32 %v3620_v36, %v3305_v37  ;;  %v3300_v52 = vor.u32 %v3618_v49, %v3297_v51  ;;  %v3344_v20 = vor.u32 %v3631_v14, %v3343_v18  ;;  %v3335_v21 = vld [vmem:[#allocation5 + $0x1b0] sm:$0xf]  ;;  %v3625_v37 = vld [vmem:[#allocation5 + $0x194] sm:$0xf0] }
 0x15e   :  { %v1552_v28 = vadd.f32 %v1551_v22, %v1539_v23  ;;  %v3629_v22 = vld [vmem:[#allocation5 + $0x1b4] sm:$0xf0] }
 0x15f   :  { %2227 = vmatpush.bf16.msrb.mxu1 %v3204_v62  ;;  %2190 = vmatpush.bf16.msra.mxu2 %v3248_v54  ;;  %v3367_v62 = vld [vmem:[#allocation5 + $0x1f0] sm:$0xf] }
 0x160   :  { %2214 = vmatpush.bf16.msrb.mxu3 %v3140_v59  ;;  %v1748_v26 = vadd.f32 %v1740_v24, %v1552_v28  ;;  %v3292_v59 = vor.u32 %v3616_v56, %v3289_v57  ;;  %v3368_v63 = vor.u32 %v3637_v50, %v3367_v62  ;;  %v3336_v28 = vor.u32 %v3629_v22, %v3335_v21  ;;  %v3319_v54 = vld [vmem:[#allocation5 + $0x190] sm:$0xf]  ;;  %v3369_v57 = vld [vmem:[#allocation5 + $0x1f8] sm:$0xf0]  ;;  %v3361_v62 = vld [vmem:[#allocation5 + $0x1e8] sm:$0xf0] }
 0x162   :  { %vm1752_vm5 = vcmp.gt.f32.partialorder %v1748_v26, 0.0  ;;  %v1756_v38 = vmul.f32 0.2, %v1748_v26  ;;  %v1553_v41 = vpop.f32.mrf.mxu3  ;;  %2196 = vmatpush.bf16.msra.mxu0 %v3368_v63 }
 0x163   :  { %2228 = vmatpush.bf16.msrb.mxu1 %v3196_v47  ;;  %v1564_v39 = vpop.f32.mrf.mxu1  ;;  %v1540_v44 = vpop.f32.mrf.mxu2  ;;  %2235 = vmatpush.bf16.msrb.mxu2 %v3308_v40  ;;  %v3268_v47 = vor.u32 %v3610_v6, %v3265_v7  ;;  %v3320_v41 = vor.u32 %v3625_v37, %v3319_v54 }
 0x164   :  { %2215 = vmatpush.bf16.msrb.mxu3 %v3132_v4  ;;  %v1760_v45 = vsel %vm1752_vm5, %v1748_v26, %v1756_v38  ;;  %v3635_v4 = vld [vmem:[#allocation5 + $0x1e4] sm:$0xf0]  ;;  %v1565_v35 = vadd.f32 %v1564_v39, %v3852_v32  ;;  %v3327_v32 = vld [vmem:[#allocation5 + $0x1a0] sm:$0xf] }
 0x165   :  { %v1590_v53 = vpop.f32.mrf.mxu0  ;;  %v3360_v5 = vor.u32 %v3635_v4, %v3359_v3  ;;  %v3328_v36 = vor.u32 %v3627_v34, %v3327_v32  ;;  %v3630_v3 = vld [vmem:[#allocation5 + $0x1c4] sm:$0xf]  ;;  %v3345_v4 = vld [vmem:[#allocation5 + $0x1c8] sm:$0xf0]  ;;  %v1742_v34 = vperm.slane %v3865_v29, 3 }
 0x167   :  { %2229 = vmatpush.bf16.msrb.mxu1 %v3188_v10  ;;  %2236 = vmatpush.bf16.msrb.mxu2 %v3300_v52  ;;  %v3260_v10 = vor.u32 %v3608_v16, %v3257_v17  ;;  %v3311_v52 = vld [vmem:[#allocation5 + $0x180] sm:$0xf]  ;;  %v3624_v16 = vld [vmem:[#allocation5 + $0x194] sm:$0xf]  ;;  %v3321_v17 = vld [vmem:[#allocation5 + $0x198] sm:$0xf0] }
 0x168   :  { %2216 = vmatpush.bf16.msrb.mxu3 %v3124_v42  ;;  %2197 = vmatpush.bf16.msra.mxu0 %v3360_v5  ;;  %v3352_v42 = vor.u32 %v3633_v12, %v3351_v11  ;;  %v3348_v5 = vor.u32 %v3630_v3, %v3345_v4  ;;  %v3626_v12 = vld [vmem:[#allocation5 + $0x1a4] sm:$0xf]  ;;  %v3324_v18 = vor.u32 %v3624_v16, %v3321_v17  ;;  %v2279_v16 = vstv %s3910_s8 }
 0x16b   :  { %2217 = vmatmul.bf16.vlgmr.msrb.gmra.mxu3 %v3873_v13  ;;  %v1764_v13 = vpack.c.bf16 %v1760_v45, %v1760_v45  ;;  %v1566_v55 = vpop.f32.mrf.mxu1  ;;  %2237 = vmatpush.bf16.msrb.mxu2 %v3292_v59  ;;  %v1741_v45 = vperm.slane %v3865_v29, 2 }
 0x16c   :  { %2198 = vmatpush.bf16.msra.mxu0 %v3352_v42  ;;  %v3636_v55 = vld [vmem:[#allocation5 + $0x1f4] sm:$0xf] }
 0x16d   :  { %2178 = vmatmul.bf16.vlgmr.msra.gmra.mxu1 %v1764_v13  ;;  %v1592_v43 = vpop.f32.mrf.mxu0  ;;  %v3372_v59 = vor.u32 %v3636_v55, %v3369_v57 }
 0x16e   :  { %v1577_v58 = vpop.f32.mrf.mxu3  ;;  %v3634_v43 = vld [vmem:[#allocation5 + $0x1e4] sm:$0xf] }
 0x16f   :  { %2238 = vmatpush.bf16.msrb.mxu2 %v3284_v61  ;;  %v1578_v23 = vadd.f32 %v1577_v58, %v1565_v35  ;;  %v3364_v63 = vor.u32 %v3634_v43, %v3361_v62 }
 0x170   :  { %2199 = vmatpush.bf16.msra.mxu0 %v3344_v20  ;;  %v3622_v20 = vld [vmem:[#allocation5 + $0x184] sm:$0xf] }
 0x171   :  { %v1591_v26 = vadd.f32 %v1590_v53, %v1578_v23  ;;  %v3623_v53 = vld [vmem:[#allocation5 + $0x184] sm:$0xf0]  ;;  %v3316_v21 = vor.u32 %v3622_v20, %v3313_v48 }
 0x172   :  { %v3312_v56 = vor.u32 %v3623_v53, %v3311_v52 }
 0x173   :  { %2239 = vmatpush.bf16.msrb.mxu2 %v3276_v2 }
 0x174   :  { %2200 = vmatpush.bf16.msra.mxu0 %v3336_v28 }
 0x176   :  { %v1579_v1 = vpop.f32.mrf.mxu3 }
 0x177   :  { %2240 = vmatpush.bf16.msrb.mxu2 %v3268_v47  ;;  %v1642_v15 = vpop.f32.mrf.mxu0  ;;  %v3353_v1 = vld [vmem:[#allocation5 + $0x1d8] sm:$0xf0]  ;;  %v3628_v47 = vld [vmem:[#allocation5 + $0x1b4] sm:$0xf] }
 0x178   :  { %2201 = vmatpush.bf16.msra.mxu0 %v3328_v36  ;;  %v3356_v2 = vor.u32 %v3632_v0, %v3353_v1 }
 0x17b   :  { %v1603_v8 = vpop.f32.mrf.mxu2  ;;  %2241 = vmatpush.bf16.msrb.mxu2 %v3260_v10 }
 0x17c   :  { %v1604_v31 = vadd.f32 %v1603_v8, %v1591_v26  ;;  %2202 = vmatpush.bf16.msra.mxu0 %v3320_v41  ;;  %v3337_v8 = vld [vmem:[#allocation5 + $0x1b8] sm:$0xf0] }
 0x17d   :  { %2230 = vmatmul.bf16.vlgmr.msrb.gmra.mxu1 %v1764_v13  ;;  %v3340_v11 = vor.u32 %v3628_v47, %v3337_v8 }
 0x17f   :  { %2242 = vmatpush.bf16.msrb.mxu2 %v3252_v25  ;;  %v1644_v30 = vpop.f32.mrf.mxu0 }
 0x180   :  { %2203 = vmatpush.bf16.msra.mxu0 %v3312_v56 }
 0x183   :  { %v1616_v24 = vpop.f32.mrf.mxu1  ;;  %v1605_v27 = vpop.f32.mrf.mxu2 }
 0x184   :  { %v1617_v38 = vadd.f32 %v1616_v24, %v1604_v31  ;;  %2248 = vmatpush.bf16.msrb.mxu0 %v3372_v59 }
 0x188   :  { %2249 = vmatpush.bf16.msrb.mxu0 %v3364_v63 }
 0x189   :  { %v1668_v49 = vpop.f32.mrf.mxu0 }
 0x18b   :  { %v1618_v39 = vpop.f32.mrf.mxu1 }
 0x18c   :  { %2250 = vmatpush.bf16.msrb.mxu0 %v3356_v2  ;;  %v2267_v2 = vld [vmem:[%s3909_s7] sm:$0x3] }
 0x18e   :  { %v1629_v40 = vpop.f32.mrf.mxu3 }
 0x18f   :  { %v1630_v44 = vadd.f32 %v1629_v40, %v1617_v38 }
 0x190   :  { %2251 = vmatpush.bf16.msrb.mxu0 %v3348_v5  ;;  %v2269_v5 = vperm.slane %v2267_v2, 0 }
 0x191   :  { %v1643_v13 = vadd.f32 %v1642_v15, %v1630_v44  ;;  %v1670_v50 = vpop.f32.mrf.mxu0  ;;  %v3329_v15 = vld [vmem:[#allocation5 + $0x1a8] sm:$0xf0]  ;;  %v1831_v44 = vld [vmem:[%s3908_s6] sm:$0x3] }
 0x192   :  { %v3332_v42 = vor.u32 %v3626_v12, %v3329_v15  ;;  %v1834_v55 = vperm.slane %v1831_v44, 1 }
 0x193   :  { %v1749_v51 = vadd.f32 %v1741_v45, %v1643_v13  ;;  %v1833_v45 = vperm.slane %v1831_v44, 0 }
 0x194   :  { %2252 = vmatpush.bf16.msrb.mxu0 %v3340_v11 }
 0x195   :  { %vm1753_vm6 = vcmp.gt.f32.partialorder %v1749_v51, 0.0  ;;  %v1757_v58 = vmul.f32 0.2, %v1749_v51 }
 0x196   :  { %v1631_v60 = vpop.f32.mrf.mxu3 }
 0x197   :  { %v1761_v9 = vsel %vm1753_vm6, %v1749_v51, %v1757_v58 }
 0x198   :  { %v1765_v61 = vpack.c.bf16 %v1761_v9, %v1761_v9  ;;  %2253 = vmatpush.bf16.msrb.mxu0 %v3332_v42 }
 0x19a   :  { %2191 = vmatmul.bf16.vlgmr.msra.gmra.mxu2 %v1765_v61 }
 0x19b   :  { %v1655_v46 = vpop.f32.mrf.mxu2 }
 0x19c   :  { %v1656_v19 = vadd.f32 %v1655_v46, %v3854_v33  ;;  %2254 = vmatpush.bf16.msrb.mxu0 %v3324_v18 }
 0x19e   :  { %v1669_v23 = vadd.f32 %v1668_v49, %v1656_v19 }
 0x1a0   :  { %2255 = vmatpush.bf16.msrb.mxu0 %v3316_v21 }
 0x1a3   :  { %v1681_v6 = vpop.f32.mrf.mxu1  ;;  %v1657_v7 = vpop.f32.mrf.mxu2 }
 0x1a4   :  { %v1682_v27 = vadd.f32 %v1681_v6, %v1669_v23  ;;  %v2270_v6 = vperm.slane %v2267_v2, 1 }
 0x1a9   :  { %v1720_v14 = vpop.f32.mrf.mxu0 }
 0x1aa   :  { %2243 = vmatmul.bf16.vlgmr.msrb.gmra.mxu2 %v1765_v61 }
 0x1ab   :  { %v1683_v10 = vpop.f32.mrf.mxu1 }
 0x1ae   :  { %v1694_v35 = vpop.f32.mrf.mxu3 }
 0x1af   :  { %v1695_v28 = vadd.f32 %v1694_v35, %v1682_v27 }
 0x1b1   :  { %v1722_v25 = vpop.f32.mrf.mxu0 }
 0x1b3   :  { %v1733_v22 = vpop.f32.mrf.mxu1 }
 0x1b6   :  { %v1696_v24 = vpop.f32.mrf.mxu3 }
 0x1bb   :  { %v1707_v30 = vpop.f32.mrf.mxu2  ;;  %v1735_v31 = vpop.f32.mrf.mxu1 }
 0x1bc   :  { %v1708_v26 = vadd.f32 %v1707_v30, %v1695_v28 }
 0x1be   :  { %v1721_v32 = vadd.f32 %v1720_v14, %v1708_v26 }
 0x1c0   :  { %v1734_v36 = vadd.f32 %v1733_v22, %v1721_v32 }
 0x1c2   :  { %v1750_v54 = vadd.f32 %v1742_v34, %v1734_v36 }
 0x1c3   :  { %v1709_v33 = vpop.f32.mrf.mxu2 }
 0x1c4   :  { %v1758_v37 = vmul.f32 0.2, %v1750_v54  ;;  %vm1754_vm7 = vcmp.gt.f32.partialorder %v1750_v54, 0.0 }
 0x1c6   :  { %v1762_v38 = vsel %vm1754_vm7, %v1750_v54, %v1758_v37 }
 0x1c7   :  { %v1766_v39 = vpack.c.bf16 %v1762_v38, %v1762_v38 }
 0x1c9   :  { %2204 = vmatmul.bf16.vlgmr.msra.gmra.mxu0 %v1766_v39 }
 0x1ce   :  { %v2166_v40 = vpop.f32.mrf.mxu3 }
 0x1cf   :  { %v2167_v49 = vadd.f32 %v2166_v40, %v1833_v45 }
 0x1d6   :  { %v2168_v41 = vpop.f32.mrf.mxu3 }
 0x1d9   :  { %2256 = vmatmul.bf16.vlgmr.msrb.gmra.mxu0 %v1766_v39 }
 0x1ea   :  { %v2179_v51 = vpop.f32.mrf.mxu1 }
 0x1eb   :  { %v2180_v29 = vadd.f32 %v2179_v51, %v2167_v49 }
 0x1ee   :  { %v2218_v13 = vpop.f32.mrf.mxu3 }
 0x1ef   :  { %v2219_v56 = vadd.f32 %v2218_v13, %v1834_v55 }
 0x1f2   :  { %v2181_v53 = vpop.f32.mrf.mxu1 }
 0x1f6   :  { %v2220_v52 = vpop.f32.mrf.mxu3 }
 0x1fa   :  { %v2231_v57 = vpop.f32.mrf.mxu1 }
 0x1fb   :  { %v2232_v58 = vadd.f32 %v2231_v57, %v2219_v56 }
 0x202   :  { %v2233_v59 = vpop.f32.mrf.mxu1 }
 0x21d   :  { %v2192_v60 = vpop.f32.mrf.mxu2 }
 0x21e   :  { %v2193_v63 = vadd.f32 %v2192_v60, %v2180_v29 }
 0x225   :  { %v2194_v9 = vpop.f32.mrf.mxu2 }
 0x22d   :  { %v2244_v61 = vpop.f32.mrf.mxu2 }
 0x22e   :  { %v2245_v0 = vadd.f32 %v2244_v61, %v2232_v58 }
 0x235   :  { %v2246_v43 = vpop.f32.mrf.mxu2 }
 0x246   :  { %v2205_v62 = vpop.f32.mrf.mxu0 }
 0x247   :  { %v2206_v46 = vadd.f32 %v2205_v62, %v2193_v63 }
 0x249   :  { %v2263_v1 = vmul.f32 0.2, %v2206_v46  ;;  %vm2261_vm8 = vcmp.gt.f32.partialorder %v2206_v46, 0.0 }
 0x24b   :  { %v2265_v47 = vsel %vm2261_vm8, %v2206_v46, %v2263_v1 }
 0x24c   :  { %v2273_v11 = vmul.f32 %v2269_v5, %v2265_v47 }
 0x24e   :  { %v2207_v50 = vpop.f32.mrf.mxu0 }
 0x256   :  { %v2257_v3 = vpop.f32.mrf.mxu0 }
 0x257   :  { %v2258_v4 = vadd.f32 %v2257_v3, %v2245_v0 }
 0x259   :  { %vm2262_vm9 = vcmp.gt.f32.partialorder %v2258_v4, 0.0  ;;  %v2264_v7 = vmul.f32 0.2, %v2258_v4 }
 0x25b   :  { %v2266_v8 = vsel %vm2262_vm9, %v2258_v4, %v2264_v7 }
 0x25c   :  { %v2274_v12 = vmul.f32 %v2270_v6, %v2266_v8 }
 0x25e   :  { %v2259_v15 = vpop.f32.mrf.mxu0  ;;  %v2275_v42 = vadd.f32 %v2274_v12, %v2273_v11 }
 0x260   :  { %2276 = vadd.xlane.f32.xlu0 %v2275_v42 }
 0x2d3   :  { %v2277_v17 = vpop.xlane.xlu0 %2276 }
 0x2d4   :  { %v2280_v10 = vadd.f32 %v2279_v16, %v2277_v17 }
 0x2d6   :  { %v3373_v35 = vmul.f32 -1.442695, %v2280_v10 }
 0x2d8   :  { %3647 = vpow2.f32 %v3373_v35 }
 0x2de   :  { %v3648_v18 = vpop.eup %3647 }
 0x2df   :  { %v2284_v14 = vadd.f32 1.0, %v3648_v18 }
 0x2e1   :  { %3649 = vrcp.f32 %v2284_v14  ;;  %v2296_v21 = vand.u32 2147483648, %v2284_v14  ;;  %v2294_v23 = vand.u32 2147483647, %v2284_v14  ;;  %vm2290_vm11 = vweird.f32 %v2284_v14 }
 0x2e3   :  { %v2297_v25 = vor.u32 1.1754944e-38, %v2296_v21  ;;  %vm2295_vm14 = vcmp.eq.f32.partialorder %v2294_v23, 8.507059e+37 }
 0x2e7   :  { %v3650_v19 = vpop.eup %3649 }
 0x2e8   :  { %v2286_v20 = vmul.f32 %v3650_v19, %v2284_v14  ;;  %vm2291_vm10 = vweird.f32 %v3650_v19 }
 0x2e9   :  { %vm2292_vm13 = vmor %vm2290_vm11, %vm2291_vm10 }
 0x2ea   :  { %v2287_v48 = vsub.f32 1.0, %v2286_v20 }
 0x2ec   :  { %v2288_v22 = vmul.f32 %v3650_v19, %v2287_v48 }
 0x2ee   :  { %v2289_v24 = vadd.f32 %v3650_v19, %v2288_v22 }
 0x2f0   :  { %v2293_v27 = vsel %vm2292_vm13, %v3650_v19, %v2289_v24 }
 0x2f1   :  { %v2298_v28 = vsel %vm2295_vm14, %v2297_v25, %v2293_v27 }
 0x2f2   :  { %2301 = vst.msk [vmem:[%s3911_s9] sm:$0xff] %vm2300_vm12, %v2298_v28 }
 0x2f3   :  { %2306 = vsyncpa [#allocation4], 1 }
 0x2f4   :  { %2307 = vsyncpa [#allocation6], 1 }

</bundles_post_ra>
